<compile_context>
chip_gen: v7x
topology: tpu7x:2x2x1
jax: 0.10.0
libtpu: 0.0.40
codegen_flags: <defaults>
</compile_context>

<pallas_src>
import numpy as np
import jax
import jax.numpy as jnp
from jax.experimental import pallas as pl
from jax.experimental.pallas import tpu as pltpu


# ----------------------------------------------------------------------------
# Anchor generation (numpy glue, identical to the standard helpers the PyTorch
# module relies on; runs at trace time).
# ----------------------------------------------------------------------------
def generate_anchor_base(base_size, ratios=(0.5, 1, 2), scales=(8, 16, 32)):
    py = base_size / 2.0
    px = base_size / 2.0
    anchor_base = np.zeros((len(ratios) * len(scales), 4), dtype=np.float32)
    for i, r in enumerate(ratios):
        for j, s in enumerate(scales):
            h = base_size * s * np.sqrt(r)
            w = base_size * s * np.sqrt(1.0 / r)
            idx = i * len(scales) + j
            anchor_base[idx, 0] = py - h / 2.0
            anchor_base[idx, 1] = px - w / 2.0
            anchor_base[idx, 2] = py + h / 2.0
            anchor_base[idx, 3] = px + w / 2.0
    return anchor_base


def generate_anchor_cell(anchor_base, stride, size):
    H, W = size
    shift_y = np.arange(0, H * stride, stride, dtype=np.float32)
    shift_x = np.arange(0, W * stride, stride, dtype=np.float32)
    sx, sy = np.meshgrid(shift_x, shift_y)
    shift = np.stack((sy.ravel(), sx.ravel(), sy.ravel(), sx.ravel()), axis=1)
    A = anchor_base.shape[0]
    K = shift.shape[0]
    anchors = (anchor_base.reshape(1, A, 4) + shift.reshape(K, 1, 4)).reshape(K * A, 4)
    return anchors.astype(np.float32)


# ----------------------------------------------------------------------------
# Pallas kernel: fused conv1(3x3, pad=1) + bias + ReLU + fused [cls|reg] heads
# ----------------------------------------------------------------------------
def rpn_fused_kernel(xp_ref, w1_ref, b1_ref, wh_ref, bh_ref, out_ref):
    """Fused RPN head for one (image, row-block) grid step.

    xp_ref : (1, H+2, W+2, Cin)  bf16 zero-padded NHWC input (whole image,
                                 VMEM-resident across the row-block axis)
    w1_ref : (9, Cin, mid)       bf16 conv1 weight, one (Cin, mid) slab per tap
    b1_ref : (1, mid)            f32 conv1 bias
    wh_ref : (mid, C_pad)        bf16 fused [cls | reg | 0-pad] 1x1 head weight
    bh_ref : (1, C_pad)          f32 fused head bias
    out_ref: (1, TH*W, C_pad)    f32 lane-dense output slab for this row block
    """
    Wp2 = xp_ref.shape[2]
    W = Wp2 - 2
    cin = xp_ref.shape[3]
    mid = w1_ref.shape[2]
    th = out_ref.shape[1] // W                       # output rows in this block
    r = pl.program_id(1)
    row0 = pl.multiple_of(r * th, th)                # first padded input row

    # conv1 as nine shifted-window accumulating matmuls (K = Cin each): the
    # 9x-duplicated im2col slab is never materialized; taps are read straight
    # from the resident bf16 input window and fed to the MXU.
    feat = jnp.zeros((th * W, mid), jnp.float32)
    for dh in range(3):
        for dw in range(3):
            tap = xp_ref[0, pl.ds(row0 + dh, th), dw:dw + W, :]   # (th, W, Cin)
            feat = feat + jnp.dot(tap.reshape(th * W, cin),
                                  w1_ref[dh * 3 + dw],
                                  preferred_element_type=jnp.float32)
    feat = jnp.maximum(feat + b1_ref[...], 0.0)

    # Fused cls|reg 1x1 heads: one matmul + one lane-dense (…, 128) store.
    # Do NOT pad C_pad to 256 for the wider v6e/v7x MXU: the head is <5% of
    # total FLOPs and padding would double the wasted head work.
    out = jnp.dot(feat.astype(wh_ref.dtype), wh_ref[...],
                  preferred_element_type=jnp.float32) + bh_ref[...]
    out_ref[0] = out


def _default_vmem_limit_bytes():
    """Derive the scoped-VMEM limit from the chip generation (v5e/v6e: 128 MiB,
    v7x: 64 MiB) instead of hard-coding one constant for all three."""
    try:
        return int(pltpu.get_tpu_info().vmem_capacity_bytes * 3 // 4)
    except Exception:  # interpret mode / older jax: safe conservative fallback
        return 48 * 1024 * 1024


def _pick_row_block(H, W, cin, mid, c_pad, vmem_limit_bytes):
    """Largest divisor of H whose per-step working set fits a slice of the VMEM
    budget, preferring >= 2 row blocks (pipelining depth + v7x megacore)."""
    # per output row: f32 feat + f32 out slab + transient bf16 tap reads
    per_row = W * (mid + c_pad) * 4 + 2 * W * cin * 2
    max_rows = max(1, (vmem_limit_bytes // 4) // max(per_row, 1))
    target = min(H, max_rows)
    if H > 1:
        target = min(target, max(1, H // 2))
    for th in range(target, 0, -1):
        if H % th == 0 and (th * W) % 8 == 0:
            return th
    return H  # whole image: block == full dim is always layout-legal


def rpn_heads(x_nchw, w1_9cm, b1, w_heads, b_heads, *,
              row_block=None, vmem_limit_bytes=None):
    """Run the fused conv/head kernel.

    Returns a lane-dense (N, H*W, C_pad) f32 slab whose first 2A channels are
    the cls logits and the next 4A channels are the reg offsets
    (channels-last, row index = h*W + w).
    """
    N, Cin, H, W = x_nchw.shape
    mid = w1_9cm.shape[2]
    c_pad = w_heads.shape[1]

    if vmem_limit_bytes is None:
        vmem_limit_bytes = _default_vmem_limit_bytes()
    if row_block is None:
        row_block = _pick_row_block(H, W, Cin, mid, c_pad, vmem_limit_bytes)
    rb = H // row_block

    # NCHW -> NHWC (channels on the lane dim), 1-px halo pad, bf16 cast: all
    # three fuse into the single mandatory XLA relayout copy.  bf16 activations
    # halve the HBM->VMEM DMA bytes and the input's VMEM footprint.
    x_nhwc = jnp.transpose(x_nchw, (0, 2, 3, 1))
    xp = jnp.pad(x_nhwc, ((0, 0), (1, 1), (1, 1), (0, 0))).astype(jnp.bfloat16)

    out_slab = pl.pallas_call(
        rpn_fused_kernel,
        out_shape=jax.ShapeDtypeStruct((N, H * W, c_pad), jnp.float32),
        grid=(N, rb),
        in_specs=[
            # Whole padded image: index_map constant in r, so it is fetched
            # once per image and stays resident while the row-block axis runs;
            # the kernel slices each 1-row-halo window with pl.ds (plain
            # Blocked BlockSpecs cannot express overlapping windows).
            pl.BlockSpec((1, H + 2, W + 2, Cin), lambda n, r: (n, 0, 0, 0)),
            # Weights / biases: constant index maps -> fetched once, resident.
            # TODO(synk): at production sizes add pipeline_mode=pl.Buffered(1)
            # here to drop the redundant second buffer of w1 (~4.7 MB on v7x).
            pl.BlockSpec((9, Cin, mid), lambda n, r: (0, 0, 0)),
            pl.BlockSpec((1, mid), lambda n, r: (0, 0)),
            pl.BlockSpec((mid, c_pad), lambda n, r: (0, 0)),
            pl.BlockSpec((1, c_pad), lambda n, r: (0, 0)),
        ],
        out_specs=pl.BlockSpec((1, row_block * W, c_pad), lambda n, r: (n, r, 0)),
        compiler_params=pltpu.CompilerParams(
            dimension_semantics=("parallel", "parallel"),
            vmem_limit_bytes=vmem_limit_bytes,
        ),
    )(xp, w1_9cm, b1, w_heads, b_heads)
    return out_slab


# ----------------------------------------------------------------------------
# Proposal (decode + clip + min-size filter + fixed-size top-k)
# ----------------------------------------------------------------------------
def loc2bbox(anchors, loc):
    ah = anchors[:, 2] - anchors[:, 0]
    aw = anchors[:, 3] - anchors[:, 1]
    acy = anchors[:, 0] + 0.5 * ah
    acx = anchors[:, 1] + 0.5 * aw
    dy, dx, dh, dw = loc[:, 0], loc[:, 1], loc[:, 2], loc[:, 3]
    cy = dy * ah + acy
    cx = dx * aw + acx
    h = jnp.exp(dh) * ah
    w = jnp.exp(dw) * aw
    return jnp.stack([cy - 0.5 * h, cx - 0.5 * w, cy + 0.5 * h, cx + 0.5 * w], axis=1)


def propose(loc, score, anchors, img_size, scale=1.0, n_post=16, min_size=16.0):
    """Simplified Proposal: decode + clip + min-size filter + fixed-size top-k."""
    roi = loc2bbox(anchors, loc)
    roi = jnp.stack([
        jnp.clip(roi[:, 0], 0.0, float(img_size[0])),
        jnp.clip(roi[:, 1], 0.0, float(img_size[1])),
        jnp.clip(roi[:, 2], 0.0, float(img_size[0])),
        jnp.clip(roi[:, 3], 0.0, float(img_size[1])),
    ], axis=1)
    hs = roi[:, 2] - roi[:, 0]
    ws = roi[:, 3] - roi[:, 1]
    thresh = min_size * scale
    keep = (hs >= thresh) & (ws >= thresh)
    masked_score = jnp.where(keep, score, -jnp.inf)
    # TODO(synk): the original Proposal applies NMS (data-dependent output
    # size) and drops sub-min-size boxes entirely; here we return a fixed
    # number of top-scoring proposals (masked -inf entries can still be
    # selected if fewer than n_post boxes survive the size filter).
    _, idx = jax.lax.top_k(masked_score, n_post)
    return roi[idx]


# ----------------------------------------------------------------------------
# Forward pass
# ----------------------------------------------------------------------------
def rpn_forward(x_nchw, params, img_size, scale=1.0, stride=32, n_post=16):
    N, Cin, H, W = x_nchw.shape
    A = params["anchor_base"].shape[0]

    out_slab = rpn_heads(x_nchw, params["w1"], params["b1"],
                         params["w_heads"], params["b_heads"])

    # Split the lane-dense slab (channels-last, row index = h*W + w).
    scores_nhwc = out_slab[:, :, :2 * A].reshape(N, H, W, 2 * A)
    locs_nhwc = out_slab[:, :, 2 * A:6 * A].reshape(N, H, W, 4 * A)

    # The reference module applies `.view(...)` directly on the NCHW conv
    # outputs (no permute), so restore NCHW before the row-major reshapes to
    # reproduce its flattening order exactly.  These tiny transposes are fused
    # by XLA with the slice/reshape chain.
    rpn_scores_nchw = jnp.transpose(scores_nhwc, (0, 3, 1, 2))   # (N, 2A, H, W)
    rpn_locs_nchw = jnp.transpose(locs_nhwc, (0, 3, 1, 2))       # (N, 4A, H, W)

    rpn_scores = rpn_scores_nchw.reshape(N, -1, 2)
    rpn_locs = rpn_locs_nchw.reshape(N, -1, 4)

    # softmax(scores.view(N, A, H, W, 2), dim=-1)[..., 1] == sigmoid(s1 - s0)
    pairs = rpn_scores_nchw.reshape(N, A, H, W, 2)
    rpn_fg_scores = jax.nn.sigmoid(pairs[..., 1] - pairs[..., 0]).reshape(N, -1)

    anchors = jnp.asarray(
        generate_anchor_cell(params["anchor_base"], stride, (H, W)))

    # Batched proposal generation: one top_k / decode for the whole batch.
    rois_boxes = jax.vmap(
        lambda loc, sc: propose(loc, sc, anchors, img_size,
                                scale=scale, n_post=n_post)
    )(rpn_locs, rpn_fg_scores)                                   # (N, n_post, 4)

    roi_indices = jnp.repeat(jnp.arange(N, dtype=jnp.int32), n_post)
    rois = jnp.concatenate(
        [roi_indices[:, None].astype(jnp.float32),
         rois_boxes.reshape(N * n_post, 4)], axis=-1)

    return rpn_locs, rpn_scores, rois, roi_indices, anchors


# ----------------------------------------------------------------------------
# Deterministic parameter init (mirrors normal_init(std=0.01), bias=0) plus
# one-time weight preparation (hoisted out of the forward hot path).
# ----------------------------------------------------------------------------
def init_params(key, in_channels, mid_channels, stride, ratios, scales,
                *, compute_dtype=jnp.bfloat16):
    anchor_base = generate_anchor_base(stride, ratios=ratios, scales=scales)
    A = anchor_base.shape[0]
    k1, k2, k3 = jax.random.split(key, 3)

    # torch layouts: conv1 (mid, in, 3, 3); cls (2A, mid, 1, 1); reg (4A, mid, 1, 1)
    w1_t = 0.01 * jax.random.normal(k1, (mid_channels, in_channels, 3, 3), jnp.float32)
    wc_t = 0.01 * jax.random.normal(k2, (A * 2, mid_channels, 1, 1), jnp.float32)
    wr_t = 0.01 * jax.random.normal(k3, (A * 4, mid_channels, 1, 1), jnp.float32)

    # conv1: OIHW -> HWIO -> (9, Cin, mid): one (Cin, mid) matmul slab per
    # (kh, kw) tap, in the same (dh, dw) order the kernel enumerates taps.
    w1_hwio = jnp.transpose(w1_t, (2, 3, 1, 0))
    w1_9cm = w1_hwio.reshape(9, in_channels, mid_channels).astype(compute_dtype)

    # Fused heads: [wc | wr | zero-pad] -> one matmul + one lane-dense store.
    wc = jnp.transpose(wc_t[:, :, 0, 0], (1, 0))     # (mid, 2A)
    wr = jnp.transpose(wr_t[:, :, 0, 0], (1, 0))     # (mid, 4A)
    bc = jnp.zeros((1, 2 * A), jnp.float32)
    br = jnp.zeros((1, 4 * A), jnp.float32)
    c_heads = 6 * A
    c_pad = ((c_heads + 127) // 128) * 128           # lane-dense output width
    w_heads = jnp.pad(jnp.concatenate([wc, wr], axis=1),
                      ((0, 0), (0, c_pad - c_heads))).astype(compute_dtype)
    b_heads = jnp.pad(jnp.concatenate([bc, br], axis=1),
                      ((0, 0), (0, c_pad - c_heads)))

    return {
        "anchor_base": anchor_base,                   # numpy, trace-time only
        "w1": w1_9cm,                                 # (9, Cin, mid) bf16
        "b1": jnp.zeros((1, mid_channels), jnp.float32),
        "w_heads": w_heads,                           # (mid, C_pad) bf16
        "b_heads": b_heads,                           # (1, C_pad) f32
    }


if __name__ == "__main__":
    key = jax.random.PRNGKey(0)
    k_param, k_x = jax.random.split(key)

    # NOTE: toy shapes badly under-fill the MXU (K=Cin=4 per tap, mid=32); the
    # toy run is per-step-overhead bound -- do not extrapolate its timings to
    # production RPN sizes (Cin=mid=512, H=W~50).
    N, Cin, H, W = 2, 4, 16, 16
    mid = 32
    stride = 32
    ratios = (0.5, 1, 2)
    scales = (8, 16, 32)
    n_post = 16

    params = init_params(k_param, Cin, mid, stride, ratios, scales)
    x = jax.random.normal(k_x, (N, Cin, H, W), jnp.float32)
    img_size = (H * stride, W * stride)

    fwd = jax.jit(lambda feat: rpn_forward(feat, params, img_size, scale=1.0,
                                           stride=stride, n_post=n_post))
    out = fwd(x)
    jax.block_until_ready(out)

    rpn_locs, rpn_scores, rois, roi_indices, anchors = out
    A = params["anchor_base"].shape[0]
    assert rpn_locs.shape == (N, A * H * W, 4)
    assert rpn_scores.shape == (N, A * H * W, 2)
    assert rois.shape == (N * n_post, 5)
    assert roi_indices.shape == (N * n_post,)
    assert anchors.shape == (H * W * A, 4)
    print("KERNEL_OK")
</pallas_src>

<mosaic_0001>
module attributes {stable_mosaic.version = 11 : i64} {
  func.func @rpn_fused_kernel(%arg0: i32, %arg1: i32, %arg2: memref<1x18x18x4xbf16, #tpu.memory_space<vmem>>, %arg3: memref<9x4x32xbf16, #tpu.memory_space<vmem>>, %arg4: memref<1x32xf32, #tpu.memory_space<vmem>>, %arg5: memref<32x128xbf16, #tpu.memory_space<vmem>>, %arg6: memref<1x128xf32, #tpu.memory_space<vmem>>, %arg7: memref<1x128x128xf32, #tpu.memory_space<vmem>>) attributes {dimension_semantics = [#tpu.dimension_semantics<parallel>, #tpu.dimension_semantics<parallel>], iteration_bounds = array<i64: 2, 2>, scalar_prefetch = 0 : i64, scratch_operands = 0 : i64, tpu.core_type = #tpu.core_type<tc>, window_params = [{transform_indices = @transform_0, window_bounds = array<i64: 1, 18, 18, 4>}, {pipeline_mode = #tpu.pipeline_mode<synchronous>, transform_indices = @transform_1, window_bounds = array<i64: 9, 4, 32>}, {pipeline_mode = #tpu.pipeline_mode<synchronous>, transform_indices = @transform_2, window_bounds = array<i64: 1, 32>}, {pipeline_mode = #tpu.pipeline_mode<synchronous>, transform_indices = @transform_3, window_bounds = array<i64: 32, 128>}, {pipeline_mode = #tpu.pipeline_mode<synchronous>, transform_indices = @transform_4, window_bounds = array<i64: 1, 128>}, {transform_indices = @transform_5, window_bounds = array<i64: 1, 128, 128>}]} {
    %c8_i32 = arith.constant 8 : i32
    %0 = arith.muli %arg1, %c8_i32 : i32
    %1 = tpu.assume_multiple %0, 8 : i32
    %cst = arith.constant 0.000000e+00 : f32
    %2 = vector.broadcast %cst : f32 to vector<128x32xf32>
    %c0_i32 = arith.constant 0 : i32
    %3 = arith.addi %1, %c0_i32 : i32
    %c0 = arith.constant 0 : index
    %4 = arith.index_cast %3 : i32 to index
    %c0_0 = arith.constant 0 : index
    %c0_1 = arith.constant 0 : index
    %5 = vector.load %arg2[%c0, %4, %c0_0, %c0_1] : memref<1x18x18x4xbf16, #tpu.memory_space<vmem>>, vector<1x8x16x4xbf16>
    %6 = vector.shape_cast %5 : vector<1x8x16x4xbf16> to vector<8x16x4xbf16>
    %7 = vector.shape_cast %6 : vector<8x16x4xbf16> to vector<128x4xbf16>
    %c0_2 = arith.constant 0 : index
    %c0_3 = arith.constant 0 : index
    %c0_4 = arith.constant 0 : index
    %8 = vector.load %arg3[%c0_2, %c0_3, %c0_4] : memref<9x4x32xbf16, #tpu.memory_space<vmem>>, vector<1x4x32xbf16>
    %9 = vector.shape_cast %8 : vector<1x4x32xbf16> to vector<4x32xbf16>
    %cst_5 = arith.constant dense<0.000000e+00> : vector<128x32xf32>
    %10 = tpu.matmul %7, %9, %cst_5 {dimension_numbers = #tpu.dot_dimension_numbers<[1], [0], [0], [1], [0, 0, 1, 1], [], []>} : vector<128x4xbf16>, vector<4x32xbf16>, vector<128x32xf32> -> vector<128x32xf32>
    %11 = arith.addf %2, %10 : vector<128x32xf32>
    %c0_i32_6 = arith.constant 0 : i32
    %12 = arith.addi %1, %c0_i32_6 : i32
    %c0_7 = arith.constant 0 : index
    %13 = arith.index_cast %12 : i32 to index
    %c1 = arith.constant 1 : index
    %c0_8 = arith.constant 0 : index
    %14 = vector.load %arg2[%c0_7, %13, %c1, %c0_8] : memref<1x18x18x4xbf16, #tpu.memory_space<vmem>>, vector<1x8x16x4xbf16>
    %15 = vector.shape_cast %14 : vector<1x8x16x4xbf16> to vector<8x16x4xbf16>
    %16 = vector.shape_cast %15 : vector<8x16x4xbf16> to vector<128x4xbf16>
    %c1_9 = arith.constant 1 : index
    %c0_10 = arith.constant 0 : index
    %c0_11 = arith.constant 0 : index
    %17 = vector.load %arg3[%c1_9, %c0_10, %c0_11] : memref<9x4x32xbf16, #tpu.memory_space<vmem>>, vector<1x4x32xbf16>
    %18 = vector.shape_cast %17 : vector<1x4x32xbf16> to vector<4x32xbf16>
    %cst_12 = arith.constant dense<0.000000e+00> : vector<128x32xf32>
    %19 = tpu.matmul %16, %18, %cst_12 {dimension_numbers = #tpu.dot_dimension_numbers<[1], [0], [0], [1], [0, 0, 1, 1], [], []>} : vector<128x4xbf16>, vector<4x32xbf16>, vector<128x32xf32> -> vector<128x32xf32>
    %20 = arith.addf %11, %19 : vector<128x32xf32>
    %c0_i32_13 = arith.constant 0 : i32
    %21 = arith.addi %1, %c0_i32_13 : i32
    %c0_14 = arith.constant 0 : index
    %22 = arith.index_cast %21 : i32 to index
    %c2 = arith.constant 2 : index
    %c0_15 = arith.constant 0 : index
    %23 = vector.load %arg2[%c0_14, %22, %c2, %c0_15] : memref<1x18x18x4xbf16, #tpu.memory_space<vmem>>, vector<1x8x16x4xbf16>
    %24 = vector.shape_cast %23 : vector<1x8x16x4xbf16> to vector<8x16x4xbf16>
    %25 = vector.shape_cast %24 : vector<8x16x4xbf16> to vector<128x4xbf16>
    %c2_16 = arith.constant 2 : index
    %c0_17 = arith.constant 0 : index
    %c0_18 = arith.constant 0 : index
    %26 = vector.load %arg3[%c2_16, %c0_17, %c0_18] : memref<9x4x32xbf16, #tpu.memory_space<vmem>>, vector<1x4x32xbf16>
    %27 = vector.shape_cast %26 : vector<1x4x32xbf16> to vector<4x32xbf16>
    %cst_19 = arith.constant dense<0.000000e+00> : vector<128x32xf32>
    %28 = tpu.matmul %25, %27, %cst_19 {dimension_numbers = #tpu.dot_dimension_numbers<[1], [0], [0], [1], [0, 0, 1, 1], [], []>} : vector<128x4xbf16>, vector<4x32xbf16>, vector<128x32xf32> -> vector<128x32xf32>
    %29 = arith.addf %20, %28 : vector<128x32xf32>
    %c1_i32 = arith.constant 1 : i32
    %30 = arith.addi %1, %c1_i32 : i32
    %c0_20 = arith.constant 0 : index
    %31 = arith.index_cast %30 : i32 to index
    %c0_21 = arith.constant 0 : index
    %c0_22 = arith.constant 0 : index
    %32 = vector.load %arg2[%c0_20, %31, %c0_21, %c0_22] : memref<1x18x18x4xbf16, #tpu.memory_space<vmem>>, vector<1x8x16x4xbf16>
    %33 = vector.shape_cast %32 : vector<1x8x16x4xbf16> to vector<8x16x4xbf16>
    %34 = vector.shape_cast %33 : vector<8x16x4xbf16> to vector<128x4xbf16>
    %c3 = arith.constant 3 : index
    %c0_23 = arith.constant 0 : index
    %c0_24 = arith.constant 0 : index
    %35 = vector.load %arg3[%c3, %c0_23, %c0_24] : memref<9x4x32xbf16, #tpu.memory_space<vmem>>, vector<1x4x32xbf16>
    %36 = vector.shape_cast %35 : vector<1x4x32xbf16> to vector<4x32xbf16>
    %cst_25 = arith.constant dense<0.000000e+00> : vector<128x32xf32>
    %37 = tpu.matmul %34, %36, %cst_25 {dimension_numbers = #tpu.dot_dimension_numbers<[1], [0], [0], [1], [0, 0, 1, 1], [], []>} : vector<128x4xbf16>, vector<4x32xbf16>, vector<128x32xf32> -> vector<128x32xf32>
    %38 = arith.addf %29, %37 : vector<128x32xf32>
    %c1_i32_26 = arith.constant 1 : i32
    %39 = arith.addi %1, %c1_i32_26 : i32
    %c0_27 = arith.constant 0 : index
    %40 = arith.index_cast %39 : i32 to index
    %c1_28 = arith.constant 1 : index
    %c0_29 = arith.constant 0 : index
    %41 = vector.load %arg2[%c0_27, %40, %c1_28, %c0_29] : memref<1x18x18x4xbf16, #tpu.memory_space<vmem>>, vector<1x8x16x4xbf16>
    %42 = vector.shape_cast %41 : vector<1x8x16x4xbf16> to vector<8x16x4xbf16>
    %43 = vector.shape_cast %42 : vector<8x16x4xbf16> to vector<128x4xbf16>
    %c4 = arith.constant 4 : index
    %c0_30 = arith.constant 0 : index
    %c0_31 = arith.constant 0 : index
    %44 = vector.load %arg3[%c4, %c0_30, %c0_31] : memref<9x4x32xbf16, #tpu.memory_space<vmem>>, vector<1x4x32xbf16>
    %45 = vector.shape_cast %44 : vector<1x4x32xbf16> to vector<4x32xbf16>
    %cst_32 = arith.constant dense<0.000000e+00> : vector<128x32xf32>
    %46 = tpu.matmul %43, %45, %cst_32 {dimension_numbers = #tpu.dot_dimension_numbers<[1], [0], [0], [1], [0, 0, 1, 1], [], []>} : vector<128x4xbf16>, vector<4x32xbf16>, vector<128x32xf32> -> vector<128x32xf32>
    %47 = arith.addf %38, %46 : vector<128x32xf32>
    %c1_i32_33 = arith.constant 1 : i32
    %48 = arith.addi %1, %c1_i32_33 : i32
    %c0_34 = arith.constant 0 : index
    %49 = arith.index_cast %48 : i32 to index
    %c2_35 = arith.constant 2 : index
    %c0_36 = arith.constant 0 : index
    %50 = vector.load %arg2[%c0_34, %49, %c2_35, %c0_36] : memref<1x18x18x4xbf16, #tpu.memory_space<vmem>>, vector<1x8x16x4xbf16>
    %51 = vector.shape_cast %50 : vector<1x8x16x4xbf16> to vector<8x16x4xbf16>
    %52 = vector.shape_cast %51 : vector<8x16x4xbf16> to vector<128x4xbf16>
    %c5 = arith.constant 5 : index
    %c0_37 = arith.constant 0 : index
    %c0_38 = arith.constant 0 : index
    %53 = vector.load %arg3[%c5, %c0_37, %c0_38] : memref<9x4x32xbf16, #tpu.memory_space<vmem>>, vector<1x4x32xbf16>
    %54 = vector.shape_cast %53 : vector<1x4x32xbf16> to vector<4x32xbf16>
    %cst_39 = arith.constant dense<0.000000e+00> : vector<128x32xf32>
    %55 = tpu.matmul %52, %54, %cst_39 {dimension_numbers = #tpu.dot_dimension_numbers<[1], [0], [0], [1], [0, 0, 1, 1], [], []>} : vector<128x4xbf16>, vector<4x32xbf16>, vector<128x32xf32> -> vector<128x32xf32>
    %56 = arith.addf %47, %55 : vector<128x32xf32>
    %c2_i32 = arith.constant 2 : i32
    %57 = arith.addi %1, %c2_i32 : i32
    %c0_40 = arith.constant 0 : index
    %58 = arith.index_cast %57 : i32 to index
    %c0_41 = arith.constant 0 : index
    %c0_42 = arith.constant 0 : index
    %59 = vector.load %arg2[%c0_40, %58, %c0_41, %c0_42] : memref<1x18x18x4xbf16, #tpu.memory_space<vmem>>, vector<1x8x16x4xbf16>
    %60 = vector.shape_cast %59 : vector<1x8x16x4xbf16> to vector<8x16x4xbf16>
    %61 = vector.shape_cast %60 : vector<8x16x4xbf16> to vector<128x4xbf16>
    %c6 = arith.constant 6 : index
    %c0_43 = arith.constant 0 : index
    %c0_44 = arith.constant 0 : index
    %62 = vector.load %arg3[%c6, %c0_43, %c0_44] : memref<9x4x32xbf16, #tpu.memory_space<vmem>>, vector<1x4x32xbf16>
    %63 = vector.shape_cast %62 : vector<1x4x32xbf16> to vector<4x32xbf16>
    %cst_45 = arith.constant dense<0.000000e+00> : vector<128x32xf32>
    %64 = tpu.matmul %61, %63, %cst_45 {dimension_numbers = #tpu.dot_dimension_numbers<[1], [0], [0], [1], [0, 0, 1, 1], [], []>} : vector<128x4xbf16>, vector<4x32xbf16>, vector<128x32xf32> -> vector<128x32xf32>
    %65 = arith.addf %56, %64 : vector<128x32xf32>
    %c2_i32_46 = arith.constant 2 : i32
    %66 = arith.addi %1, %c2_i32_46 : i32
    %c0_47 = arith.constant 0 : index
    %67 = arith.index_cast %66 : i32 to index
    %c1_48 = arith.constant 1 : index
    %c0_49 = arith.constant 0 : index
    %68 = vector.load %arg2[%c0_47, %67, %c1_48, %c0_49] : memref<1x18x18x4xbf16, #tpu.memory_space<vmem>>, vector<1x8x16x4xbf16>
    %69 = vector.shape_cast %68 : vector<1x8x16x4xbf16> to vector<8x16x4xbf16>
    %70 = vector.shape_cast %69 : vector<8x16x4xbf16> to vector<128x4xbf16>
    %c7 = arith.constant 7 : index
    %c0_50 = arith.constant 0 : index
    %c0_51 = arith.constant 0 : index
    %71 = vector.load %arg3[%c7, %c0_50, %c0_51] : memref<9x4x32xbf16, #tpu.memory_space<vmem>>, vector<1x4x32xbf16>
    %72 = vector.shape_cast %71 : vector<1x4x32xbf16> to vector<4x32xbf16>
    %cst_52 = arith.constant dense<0.000000e+00> : vector<128x32xf32>
    %73 = tpu.matmul %70, %72, %cst_52 {dimension_numbers = #tpu.dot_dimension_numbers<[1], [0], [0], [1], [0, 0, 1, 1], [], []>} : vector<128x4xbf16>, vector<4x32xbf16>, vector<128x32xf32> -> vector<128x32xf32>
    %74 = arith.addf %65, %73 : vector<128x32xf32>
    %c2_i32_53 = arith.constant 2 : i32
    %75 = arith.addi %1, %c2_i32_53 : i32
    %c0_54 = arith.constant 0 : index
    %76 = arith.index_cast %75 : i32 to index
    %c2_55 = arith.constant 2 : index
    %c0_56 = arith.constant 0 : index
    %77 = vector.load %arg2[%c0_54, %76, %c2_55, %c0_56] : memref<1x18x18x4xbf16, #tpu.memory_space<vmem>>, vector<1x8x16x4xbf16>
    %78 = vector.shape_cast %77 : vector<1x8x16x4xbf16> to vector<8x16x4xbf16>
    %79 = vector.shape_cast %78 : vector<8x16x4xbf16> to vector<128x4xbf16>
    %c8 = arith.constant 8 : index
    %c0_57 = arith.constant 0 : index
    %c0_58 = arith.constant 0 : index
    %80 = vector.load %arg3[%c8, %c0_57, %c0_58] : memref<9x4x32xbf16, #tpu.memory_space<vmem>>, vector<1x4x32xbf16>
    %81 = vector.shape_cast %80 : vector<1x4x32xbf16> to vector<4x32xbf16>
    %cst_59 = arith.constant dense<0.000000e+00> : vector<128x32xf32>
    %82 = tpu.matmul %79, %81, %cst_59 {dimension_numbers = #tpu.dot_dimension_numbers<[1], [0], [0], [1], [0, 0, 1, 1], [], []>} : vector<128x4xbf16>, vector<4x32xbf16>, vector<128x32xf32> -> vector<128x32xf32>
    %83 = arith.addf %74, %82 : vector<128x32xf32>
    %c0_60 = arith.constant 0 : index
    %c0_61 = arith.constant 0 : index
    %84 = vector.load %arg4[%c0_60, %c0_61] : memref<1x32xf32, #tpu.memory_space<vmem>>, vector<1x32xf32>
    %85 = vector.broadcast %84 : vector<1x32xf32> to vector<128x32xf32>
    %86 = arith.addf %83, %85 : vector<128x32xf32>
    %cst_62 = arith.constant 0.000000e+00 : f32
    %87 = vector.broadcast %cst_62 : f32 to vector<128x32xf32>
    %88 = arith.maximumf %86, %87 : vector<128x32xf32>
    %89 = arith.truncf %88 : vector<128x32xf32> to vector<128x32xbf16>
    %c0_63 = arith.constant 0 : index
    %c0_64 = arith.constant 0 : index
    %90 = vector.load %arg5[%c0_63, %c0_64] : memref<32x128xbf16, #tpu.memory_space<vmem>>, vector<32x128xbf16>
    %cst_65 = arith.constant dense<0.000000e+00> : vector<128x128xf32>
    %91 = tpu.matmul %89, %90, %cst_65 {dimension_numbers = #tpu.dot_dimension_numbers<[1], [0], [0], [1], [0, 0, 1, 1], [], []>} : vector<128x32xbf16>, vector<32x128xbf16>, vector<128x128xf32> -> vector<128x128xf32>
    %c0_66 = arith.constant 0 : index
    %c0_67 = arith.constant 0 : index
    %92 = vector.load %arg6[%c0_66, %c0_67] : memref<1x128xf32, #tpu.memory_space<vmem>>, vector<1x128xf32>
    %93 = vector.broadcast %92 : vector<1x128xf32> to vector<128x128xf32>
    %94 = arith.addf %91, %93 : vector<128x128xf32>
    %c0_68 = arith.constant 0 : index
    %c0_69 = arith.constant 0 : index
    %c0_70 = arith.constant 0 : index
    %95 = vector.load %arg7[%c0_68, %c0_69, %c0_70] : memref<1x128x128xf32, #tpu.memory_space<vmem>>, vector<1x128x128xf32>
    %96 = vector.shape_cast %95 : vector<1x128x128xf32> to vector<128x128xf32>
    %97 = vector.shape_cast %94 : vector<128x128xf32> to vector<1x128x128xf32>
    tpu.vector_store %arg7[%c0_68, %c0_69, %c0_70], %97 {strides = array<i32>} : memref<1x128x128xf32, #tpu.memory_space<vmem>>, vector<1x128x128xf32>,
    return
  }
  func.func @transform_0(%arg0: i32, %arg1: i32) -> (i32, i32, i32, i32) {
    %c0_i32 = arith.constant 0 : i32
    %c0_i32_0 = arith.constant 0 : i32
    %c0_i32_1 = arith.constant 0 : i32
    %c0_i32_2 = arith.constant 0 : i32
    return %arg0, %c0_i32, %c0_i32_0, %c0_i32_1 : i32, i32, i32, i32
  }
  func.func @transform_1(%arg0: i32, %arg1: i32) -> (i32, i32, i32) {
    %c0_i32 = arith.constant 0 : i32
    %c0_i32_0 = arith.constant 0 : i32
    %c0_i32_1 = arith.constant 0 : i32
    %c0_i32_2 = arith.constant 0 : i32
    return %c0_i32, %c0_i32_0, %c0_i32_1 : i32, i32, i32
  }
  func.func @transform_2(%arg0: i32, %arg1: i32) -> (i32, i32) {
    %c0_i32 = arith.constant 0 : i32
    %c0_i32_0 = arith.constant 0 : i32
    %c0_i32_1 = arith.constant 0 : i32
    return %c0_i32, %c0_i32_0 : i32, i32
  }
  func.func @transform_3(%arg0: i32, %arg1: i32) -> (i32, i32) {
    %c0_i32 = arith.constant 0 : i32
    %c0_i32_0 = arith.constant 0 : i32
    %c0_i32_1 = arith.constant 0 : i32
    return %c0_i32, %c0_i32_0 : i32, i32
  }
  func.func @transform_4(%arg0: i32, %arg1: i32) -> (i32, i32) {
    %c0_i32 = arith.constant 0 : i32
    %c0_i32_0 = arith.constant 0 : i32
    %c0_i32_1 = arith.constant 0 : i32
    return %c0_i32, %c0_i32_0 : i32, i32
  }
  func.func @transform_5(%arg0: i32, %arg1: i32) -> (i32, i32, i32) {
    %c0_i32 = arith.constant 0 : i32
    %c0_i32_0 = arith.constant 0 : i32
    return %arg0, %arg1, %c0_i32 : i32, i32, i32
  }
}

</mosaic_0001>

<bundles_post_ra>
// kernel: _lambda_.1
= control target key start
LH: loop header
LB: loop body
LE: loop exit
PB: predicated region body
PF: predicated region fallthrough
CT: control target
= control target key end

     0   :  { %10 = vsyncpa [#allocation3], 0  ;;  %s5011_s0 = inlined_call_operand.vmem [shape: bf16[2,18,18,4], index: 0, kind: input, shape index: {}]   ;;  %s5012_s1 = inlined_call_operand.hbm [shape: bf16[9,4,32], index: 1, kind: input, shape index: {}]   ;;  %s5013_s2 = inlined_call_operand.vmem [shape: f32[1,32], index: 2, kind: input, shape index: {}]   ;;  %s5014_s3 = inlined_call_operand.hbm [shape: bf16[32,128], index: 3, kind: input, shape index: {}]   ;;  %s5015_s4 = inlined_call_operand.vmem [shape: f32[1,128], index: 4, kind: input, shape index: {}]   ;;  %s5016_s5 = inlined_call_operand.vmem [shape: f32[2,256,128], index: 5, kind: output, shape index: {}]  }
   0x1   :  { %11 = vsyncpa [#allocation5], 0  ;;  %s4009_s18 = smov 0   ;;  %s4011_s19 = smov 0  }
   0x2   :  { %s4013_s20 = smov 0   ;;  %s4015_s21 = smov 0  }
   0x3   :  { %s4017_s22 = smov 0  }
   0x4 LB: > { %s3068_s23 = sadd.s32 4294967295, %s3971_s22   ;;  %s26_s24 = sadd.s32 1, %s3963_s20  ;;  %s3971_s22 = sphi %s4017_s22, %s17_s22   ;;  %s3967_s21 = sphi %s4015_s21, %s5048_s21   ;;  %s3963_s20 = sphi %s4013_s20, %s5047_s20   ;;  %s3959_s19 = sphi %s4011_s19, %s5046_s19   ;;  %s3955_s18 = sphi %s4009_s18, %s5045_s18  }
   0x5   : > { %p27_p0 = scmp.ge.s32.totalorder %s26_s24, 2  ;;  %s29_s25 = sadd.s32 1, %s3967_s21 }
   0x6   : > { %p3070_p1 = scmp.ge.s32.totalorder %s3971_s22, 1  ;;  %p172_p2 = scmp.lt.s32.totalorder %s3971_s22, 5 }
   0x7   : > { %s5050_s24 = smov (%p27_p0, %s26_s24), 0  ;;  %s5052_s25 = smov (!%p27_p0, %s29_s25), %s3967_s21 }
   0x8   : > { %p4042_p3 = pnand %p3070_p1, %p172_p2  ;;  %p31_p4 = scmp.ge.s32.totalorder %s5052_s25, 2 }
   0x9   : > { %p4046_p5 = scmp.eq.s32.totalorder %s3068_s23, 0  ;;  %s3973_s28 = smov [#allocation2]  }
   0xa   : > { %s5025_s26 = scalar_select %p4042_p3, 1, 0 }
   0xb   : > { %s5026_s27 = scalar_select %p4046_p5, 1, 0 }
   0xc   : > { %p3786_p6 = pneg %p4042_p3  ;;  %s5054_s25 = smov (%p31_p4, %s5052_s25), 0 }
   0xd   : > { %s184_s29 = sshll.u32 %s3973_s28, 4  ;;  %s3869_s8 = scalar_lea.hbm %s5012_s1, 288  ;;  %s185_s29 = int_to_ptr.vmem [resolvable:$true] %s184_s29 }
   0xe   : > { %p4056_p7 = pnand %p4046_p5, %p3786_p6  ;;  %p3870_p8 = scmp.ne.s32.totalorder %s5012_s1, %s3869_s8 }
   0xf   : > { %p3876_p12 = scmp.lt.u32.totalorder %s3869_s8, %s5012_s1 }
  0x10   : > { %p3871_p9 = pneg %p4056_p7 }
  0x12   : > { %p3872_p10 = pnand %p3871_p9, %p3870_p8 }
  0x14   : > { %p3873_p11 = pneg %p3872_p10 }
  0x16   : > { %p3878_p13 = pnand %p3876_p12, %p3873_p11 }
  0x18   : > { %3881 = shalt.err (!%p3878_p13)
}
  0x19   : > { %s3882_s13 = scalar_lea.vmem %s185_s29, 288  ;;  %p3890_p4 = scmp.lt.s32.totalorder %s185_s29, %s185_s29 }
  0x1a   : > { %p3883_p0 = scmp.ne.s32.totalorder %s185_s29, %s3882_s13  ;;  %p3891_p6 = scmp.lt.s32.totalorder %s3882_s13, %s3882_s13 }
  0x1c   : > { %p3885_p1 = pnand %p3883_p0, %p3871_p9  ;;  %p3892_p5 = por %p3891_p6, %p3890_p4 }
  0x1e   : > { %p3886_p2 = pneg %p3885_p1 }
  0x20   : > { %p3893_p3 = pnand %p3892_p5, %p3886_p2 }
  0x22   : > { %3896 = shalt.err (!%p3893_p3)
}
  0x23   : > { %s3974_s14 = smov 32   ;;  %s3975_s15 = smov 2  }
  0x24   : > { %3789 = dma.hbm_to_vmem [thread:$0]  (!%p4056_p7), %s5012_s1, 288, %s185_s29, [#allocation3], %s3974_s14, %s3974_s14, %s3975_s15  }
  0x25   : > { %s3976_s23 = smov [#allocation4]   ;;  %s3897_s8 = scalar_lea.hbm %s5014_s3, 256 }
  0x26   : > { %s200_s28 = sshll.u32 %s3976_s23, 4  ;;  %p3898_p3 = scmp.ne.s32.totalorder %s5014_s3, %s3897_s8  ;;  %s201_s28 = int_to_ptr.vmem [resolvable:$true] %s200_s28 }
  0x27   : > { %p3904_p10 = scmp.lt.u32.totalorder %s3897_s8, %s5014_s3 }
  0x28   : > { %p3900_p5 = pnand %p3898_p3, %p3871_p9 }
  0x2a   : > { %p3901_p8 = pneg %p3900_p5 }
  0x2c   : > { %p3906_p11 = pnand %p3904_p10, %p3901_p8 }
  0x2e   : > { %3909 = shalt.err (!%p3906_p11)
}
  0x2f   : > { %s3910_s29 = scalar_lea.vmem %s201_s28, 256  ;;  %p3918_p1 = scmp.lt.s32.totalorder %s201_s28, %s201_s28 }
  0x30   : > { %p3911_p12 = scmp.ne.s32.totalorder %s201_s28, %s3910_s29  ;;  %p3919_p2 = scmp.lt.s32.totalorder %s3910_s29, %s3910_s29 }
  0x32   : > { %p3913_p13 = pnand %p3911_p12, %p3871_p9  ;;  %p3920_p4 = por %p3919_p2, %p3918_p1 }
  0x34   : > { %p3914_p0 = pneg %p3913_p13 }
  0x36   : > { %p3921_p6 = pnand %p3920_p4, %p3914_p0 }
  0x38   : > { %3924 = shalt.err (!%p3921_p6)
}
  0x39   : > { %s3977_s13 = smov 64   ;;  %s3978_s14 = smov 4  }
  0x3a   : > { %3792 = dma.hbm_to_vmem [thread:$0]  (!%p4056_p7), %s5014_s3, 256, %s201_s28, [#allocation5], %s3977_s13, %s3977_s13, %s3978_s14  }
  0x3b   : > { %p5028_p3 = scmp.ne.s32.totalorder %s5025_s26, 0 }
  0x3d   : > { %227 = sbr.rel (%p5028_p3) target bundleno = 727 (0x2d7), region = 40 }
  0x44   : > { %p5029_p5 = scmp.ne.s32.totalorder %s5026_s27, 0 }
  0x46   : > { %3946 = dma.done.wait (%p5029_p5), [#allocation3], 288  }
  0x47   : > { %3948 = vsyncadd (%p5029_p5), [#allocation3], 4294967008 }
  0x48   : > { %3950 = dma.done.wait (%p5029_p5), [#allocation5], 256  }
  0x49   : > { %3952 = vsyncadd (%p5029_p5), [#allocation5], 4294967040  ;;  %p263_p9 = scmp.lt.s32.totalorder %s3959_s19, 1  ;;  %s3366_s26 = smul.u32 96, %s3955_s18  ;;  %vm554_vm0 = vcmask 1041408   ;;  %vm529_vm4 = vcmask 31744  }
  0x4a   : > { %vm308_vm1 = vsmask.f32 3328  ;;  %vm309_vm2 = vsmask.f32 7440  ;;  %v1487_v0 = vld [vmem:[#allocation2 + $0x8] sm:$0x3] }
  0x4b   : > { %s5056_s19 = smov (!%p263_p9, %s3959_s19), 1  ;;  %v504_v1 = vld [vmem:[#allocation2 + $0x2] sm:$0x3]  ;;  %v4123_v2 = vld [vmem:[#allocation2 + $0xa] sm:$0x3]  ;;  %3772 = vmatprep.subr.msk.bf16.mxu0 %vm554_vm0, %v1487_v0  ;;  %v1537_v3 = vsel %vm554_vm0, %v1487_v0, 0  ;;  %vm4160_vm3 = vmor %vm308_vm1, %vm309_vm2 }
  0x4c   : > { %s3777_s30 = smul.u32 216, %s5056_s19  ;;  %3768 = vmatprep.subr.msk.bf16.mxu1 %vm554_vm0, %v504_v1  ;;  %v556_v4 = vsel %vm554_vm0, %v504_v1, 0  ;;  %3531 = vmatpush3.bf16.msra.mxu0 %v1537_v3  ;;  %vm843_vm5 = vcmask 1042432   ;;  %vm844_vm6 = vcmask 1046532   ;;  %vm2814_vm8 = vcmask 261120   ;;  %s3078_s8 = sshll.u32 %s3955_s18, 4 }
  0x4d   : > { %3459 = vmatpush3.bf16.msra.mxu1 %v556_v4  ;;  %3773 = vmatprep.subr.msk.bf16.mxu0 %vm554_vm0, %v4123_v2  ;;  %vm4417_vm7 = vmor %vm843_vm5, %vm844_vm6  ;;  %p271_p7 = scmp.lt.s32.totalorder %s3078_s8, 31  ;;  %s3079_s9 = sshll.u32 %s5056_s19, 5 }
  0x4e   : > { %s267_s28 = scalar_lea.vmem %s5011_s0, %s3777_s30 }
  0x4f   : > { %s4121_s27 = scalar_lea.vmem %s267_s28, %s3366_s26  ;;  %s5058_s8 = smov (!%p271_p7, %s3078_s8), 31 }
  0x50   : > { %v4130_v5 = vld [vmem:[%s4121_s27] sm:$0xf]  ;;  %v4133_v6 = vld [vmem:[%s4121_s27 + $0x4] sm:$0xf]  ;;  %v4136_v7 = vld [vmem:[%s4121_s27 + $0x8] sm:$0x1]  ;;  %s274_s10 = sadd.s32 %s3079_s9, %s5058_s8 }
  0x51   : > { %v312_v8 = vshrl.u32 %v4130_v5, 16  ;;  %v315_v9 = vshll.u32 %v4130_v5, 16  ;;  %v321_v10 = vshll.u32 %v4133_v6, 16  ;;  %v325_v11 = vshrl.u32 %v4133_v6, 16  ;;  %v3174_v13 = vld [vmem:[%s4121_s27 + $0xc] sm:$0xf] }
  0x52   : > { %v331_v12 = vshll.u32 %v4136_v7, 16  ;;  %v4145_v14 = vld [vmem:[%s4121_s27 + $0x10] sm:$0xf]  ;;  %v4150_v19 = vld [vmem:[%s4121_s27 + $0x14] sm:$0x1]  ;;  %v1295_v21 = vshrl.u32 %v3174_v13, 16 }
  0x53   : > { %v314_v15 = vrot.slane %v312_v8, 4  ;;  %v317_v16 = vrot.slane %v315_v9, 5  ;;  %v323_v17 = vrot.slane %v321_v10, 5  ;;  %v327_v18 = vrot.slane %v325_v11, 4  ;;  %v4156_v28 = vld [vmem:[%s4121_s27 + $0xc] sm:$0xf] }
  0x54   : > { %v333_v20 = vrot.slane %v331_v12, 5  ;;  %v1298_v22 = vshll.u32 %v3174_v13, 16  ;;  %v1304_v23 = vshll.u32 %v4145_v14, 16  ;;  %v1308_v26 = vshrl.u32 %v4145_v14, 16  ;;  %v4165_v33 = vld [vmem:[%s4121_s27 + $0x10] sm:$0xf] }
  0x55   : > { %v318_v24 = vor.u32 %v317_v16, %v314_v15  ;;  %v328_v25 = vor.u32 %v327_v18, %v323_v17  ;;  %v1314_v27 = vshll.u32 %v4150_v19, 16  ;;  %v1297_v30 = vrot.slane %v1295_v21, 4  ;;  %v4168_v39 = vld [vmem:[%s4121_s27 + $0x14] sm:$0x1]  ;;  %v3177_v50 = vld [vmem:[%s4121_s27 + $0x18] sm:$0xf] }
  0x56   : > { %v1300_v31 = vrot.slane %v1298_v22, 5  ;;  %v1306_v32 = vrot.slane %v1304_v23, 5  ;;  %v1310_v36 = vrot.slane %v1308_v26, 4  ;;  %v336_v40 = vshrl.u32 %v4156_v28, 16  ;;  %v4181_v55 = vld [vmem:[%s4121_s27 + $0x1c] sm:$0xf] }
  0x57   : > { %v319_v34 = vrot.slane %v318_v24, 4  ;;  %v329_v35 = vrot.slane %v328_v25, 4  ;;  %v1316_v38 = vrot.slane %v1314_v27, 5  ;;  %v339_v41 = vshll.u32 %v4156_v28, 16  ;;  %v4187_v58 = vld [vmem:[%s4121_s27 + $0x20] sm:$0x1] }
  0x58   : > { %v1301_v37 = vor.u32 %v1300_v31, %v1297_v30  ;;  %v1311_v44 = vor.u32 %v1310_v36, %v1306_v32  ;;  %v345_v45 = vshll.u32 %v4165_v33, 16  ;;  %v338_v48 = vrot.slane %v336_v40, 4  ;;  %v4195_v11 = vld [vmem:[%s4121_s27 + $0x18] sm:$0xf]  ;;  %v4200_v16 = vld [vmem:[%s4121_s27 + $0x1c] sm:$0xf] }
  0x59   : > { %v324_v42 = vsel %vm4160_vm3, %v319_v34, %v323_v17  ;;  %v334_v43 = vsel %vm4160_vm3, %v329_v35, %v333_v20  ;;  %v341_v49 = vrot.slane %v339_v41, 5  ;;  %v349_v53 = vshrl.u32 %v4165_v33, 16  ;;  %v4208_v25 = vld [vmem:[%s4121_s27 + $0x20] sm:$0x1]  ;;  %v3180_v34 = vld [vmem:[%s4121_s27 + $0x24] sm:$0xf] }
  0x5a   : > { %v3084_v46 = vcombine.low %v324_v42, %v334_v43  ;;  %v1302_v47 = vrot.slane %v1301_v37, 4  ;;  %v1312_v51 = vrot.slane %v1311_v44, 4  ;;  %v347_v52 = vrot.slane %v345_v45, 5  ;;  %5032 = vst [vmem:[#allocation8_spill] sm:$0xff] %v4208_v25  ;;  %s3080_s11 = sshll.u32 %s274_s10, 3 }
  0x5b   : > { %v355_v54 = vshll.u32 %v4168_v39, 16  ;;  %v342_v57 = vor.u32 %v341_v49, %v338_v48  ;;  %v351_v60 = vrot.slane %v349_v53, 4  ;;  %v1319_v62 = vshrl.u32 %v3177_v50, 16  ;;  %v4231_v53 = vld [vmem:[%s4121_s27 + $0x24] sm:$0xf]  ;;  %s4978_s15 = scalar_lea.vmem %s5016_s5, %s3080_s11 }
  0x5c   : > { %3460 = vmatprep.mubr.msk.bf16.mxu1 %vm529_vm4, %v3084_v46  ;;  %v1307_v56 = vsel %vm4160_vm3, %v1302_v47, %v1306_v32  ;;  %v1317_v59 = vsel %vm4160_vm3, %v1312_v51, %v1316_v38  ;;  %v1322_v1 = vshll.u32 %v3177_v50, 16  ;;  %v1328_v3 = vshll.u32 %v4181_v55, 16  ;;  %v4225_v46 = vld [vmem:[%s4121_s27 + $0x2c] sm:$0x1] }
  0x5d   : > { %v357_v61 = vrot.slane %v355_v54, 5  ;;  %v3198_v63 = vcombine.low %v1307_v56, %v1317_v59  ;;  %v343_v0 = vrot.slane %v342_v57, 4  ;;  %v352_v4 = vor.u32 %v351_v60, %v347_v52  ;;  %v4234_v60 = vld [vmem:[%s4121_s27 + $0x28] sm:$0xf] }
  0x5e   : > { %v1321_v8 = vrot.slane %v1319_v62, 4  ;;  %v1332_v9 = vshrl.u32 %v4181_v55, 16  ;;  %v1338_v10 = vshll.u32 %v4187_v58, 16  ;;  %v1324_v13 = vrot.slane %v1322_v1, 5 }
  0x5f   : > { %3532 = vmatprep.mubr.msk.bf16.mxu0 %vm529_vm4, %v3198_v63  ;;  %v1330_v15 = vrot.slane %v1328_v3, 5  ;;  %v348_v18 = vsel %vm4160_vm3, %v343_v0, %v347_v52  ;;  %v353_v20 = vrot.slane %v352_v4, 4  ;;  %v1791_v24 = vsel %vm554_vm0, %v4123_v2, 0  ;;  %v4218_v2 = vld [vmem:[%s4121_s27 + $0x28] sm:$0xf] }
  0x60   : > { %v1334_v21 = vrot.slane %v1332_v9, 4  ;;  %v1325_v22 = vor.u32 %v1324_v13, %v1321_v8  ;;  %v1340_v23 = vrot.slane %v1338_v10, 5  ;;  %v360_v26 = vshrl.u32 %v4195_v11, 16  ;;  %v4240_v4 = vld [vmem:[%s4121_s27 + $0x2c] sm:$0x1] }
  0x61   : > { %v358_v27 = vsel %vm4160_vm3, %v353_v20, %v357_v61  ;;  %v363_v31 = vshll.u32 %v4195_v11, 16  ;;  %v369_v32 = vshll.u32 %v4200_v16, 16  ;;  %v373_v38 = vshrl.u32 %v4200_v16, 16  ;;  %v3183_v20 = vld [vmem:[%s4121_s27 + $0x30] sm:$0xf] }
  0x62   : > { %v1335_v30 = vor.u32 %v1334_v21, %v1330_v15  ;;  %v3085_v35 = vcombine.low %v348_v18, %v358_v27  ;;  %v1326_v36 = vrot.slane %v1325_v22, 4  ;;  %v362_v37 = vrot.slane %v360_v26, 4  ;;  %v4251_v27 = vld [vmem:[%s4121_s27 + $0x34] sm:$0xf] }
  0x63   : > { %v365_v41 = vrot.slane %v363_v31, 5  ;;  %v371_v42 = vrot.slane %v369_v32, 5  ;;  %v379_v43 = vshll.u32 %v4208_v25, 16  ;;  %v375_v45 = vrot.slane %v373_v38, 4 }
  0x64   : > { %v1336_v40 = vrot.slane %v1335_v30, 4  ;;  %3461 = vmatmul.mubr.msk.bf16.vlgmr.msra.gmra.mrb[0].mxu1 %vm529_vm4, %v3085_v35  ;;  %v1331_v44 = vsel %vm4160_vm3, %v1326_v36, %v1330_v15  ;;  %v1343_v47 = vshrl.u32 %v3180_v34, 16  ;;  %v1346_v48 = vshll.u32 %v3180_v34, 16 }
  0x65   : > { %v366_v50 = vor.u32 %v365_v41, %v362_v37  ;;  %v381_v51 = vrot.slane %v379_v43, 5  ;;  %v1352_v52 = vshll.u32 %v4218_v2, 16  ;;  %v376_v56 = vor.u32 %v375_v45, %v371_v42  ;;  %v4259_v41 = vld [vmem:[%s4121_s27 + $0x38] sm:$0x1] }
  0x66   : > { %v1341_v49 = vsel %vm4160_vm3, %v1336_v40, %v1340_v23  ;;  %v1345_v57 = vrot.slane %v1343_v47, 4  ;;  %v1348_v59 = vrot.slane %v1346_v48, 5  ;;  %v1356_v63 = vshrl.u32 %v4218_v2, 16 }
  0x67   : > { %v3199_v54 = vcombine.low %v1331_v44, %v1341_v49  ;;  %v367_v61 = vrot.slane %v366_v50, 4  ;;  %v1354_v62 = vrot.slane %v1352_v52, 5  ;;  %v1362_v0 = vshll.u32 %v4225_v46, 16  ;;  %v4264_v49 = vld [vmem:[%s4121_s27 + $0x30] sm:$0xf] }
  0x68   : > { %v377_v1 = vrot.slane %v376_v56, 4  ;;  %v1349_v3 = vor.u32 %v1348_v59, %v1345_v57  ;;  %v384_v8 = vshrl.u32 %v4231_v53, 16  ;;  %v387_v9 = vshll.u32 %v4231_v53, 16  ;;  %v4269_v56 = vld [vmem:[%s4121_s27 + $0x34] sm:$0xf] }
  0x69   : > { %3533 = vmatmul.mubr.msk.bf16.vlgmr.msra.gmra.mrb[0].mxu0 %vm529_vm4, %v3199_v54  ;;  %v372_v10 = vsel %vm4160_vm3, %v367_v61, %v371_v42  ;;  %v1358_v13 = vrot.slane %v1356_v63, 4  ;;  %v1364_v15 = vrot.slane %v1362_v0, 5  ;;  %v393_v18 = vshll.u32 %v4234_v60, 16  ;;  %v4275_v63 = vld [vmem:[%s4121_s27 + $0x38] sm:$0x1] }
  0x6a   : > { %3549 = vmatpush3.bf16.msra.mxu0 %v1791_v24  ;;  %v382_v21 = vsel %vm4160_vm3, %v377_v1, %v381_v51  ;;  %v1350_v22 = vrot.slane %v1349_v3, 4  ;;  %v386_v23 = vrot.slane %v384_v8, 4  ;;  %v389_v26 = vrot.slane %v387_v9, 5  ;;  %v3186_v9 = vld [vmem:[%s4121_s27 + $0x3c] sm:$0xf] }
  0x6b   : > { %v3086_v30 = vcombine.low %v372_v10, %v382_v21  ;;  %v1359_v31 = vor.u32 %v1358_v13, %v1354_v62  ;;  %v395_v24 = vrot.slane %v393_v18, 5  ;;  %v397_v32 = vshrl.u32 %v4234_v60, 16 }
  0x6c   : > { %v1355_v34 = vsel %vm4160_vm3, %v1350_v22, %v1354_v62  ;;  %v390_v35 = vor.u32 %v389_v26, %v386_v23  ;;  %v403_v36 = vshll.u32 %v4240_v4, 16  ;;  %v1367_v37 = vshrl.u32 %v3183_v20, 16 }
  0x6d   : > { %3464 = vmatprep.mubr.msk.bf16.mxu1 %vm529_vm4, %v3086_v30  ;;  %v1360_v38 = vrot.slane %v1359_v31, 4  ;;  %v399_v40 = vrot.slane %v397_v32, 4  ;;  %v1370_v42 = vshll.u32 %v3183_v20, 16  ;;  %v1376_v43 = vshll.u32 %v4251_v27, 16  ;;  %v4283_v20 = vld [vmem:[#allocation2] sm:$0x3] }
  0x6e   : > { %v391_v44 = vrot.slane %v390_v35, 4  ;;  %v405_v45 = vrot.slane %v403_v36, 5  ;;  %v1369_v47 = vrot.slane %v1367_v37, 4  ;;  %v1380_v48 = vshrl.u32 %v4251_v27, 16  ;;  %v4288_v30 = vld [vmem:[%s4121_s27 + $0x40] sm:$0xf]  ;;  %3769 = vmatprep.subr.msk.bf16.mxu1 %vm554_vm0, %v4283_v20 }
  0x6f   : > { %v1365_v50 = vsel %vm4160_vm3, %v1360_v38, %v1364_v15  ;;  %v400_v51 = vor.u32 %v399_v40, %v395_v24  ;;  %v1372_v52 = vrot.slane %v1370_v42, 5  ;;  %v1378_v54 = vrot.slane %v1376_v43, 5  ;;  %v4292_v35 = vld [vmem:[#allocation2 + $0xc] sm:$0x3] }
  0x70   : > { %v3200_v57 = vcombine.low %v1355_v34, %v1365_v50  ;;  %v396_v59 = vsel %vm4160_vm3, %v391_v44, %v395_v24  ;;  %v1382_v61 = vrot.slane %v1380_v48, 4  ;;  %v1386_v62 = vshll.u32 %v4259_v41, 16  ;;  %3774 = vmatprep.subr.msk.bf16.mxu0 %vm554_vm0, %v4292_v35  ;;  %v4303_v44 = vld [vmem:[%s4121_s27 + $0x44] sm:$0x1]  ;;  %v4307_v48 = vld [vmem:[%s4121_s27 + $0x3c] sm:$0xf] }
  0x71   : > { %v401_v0 = vrot.slane %v400_v51, 4  ;;  %v1373_v1 = vor.u32 %v1372_v52, %v1369_v47  ;;  %v408_v3 = vshrl.u32 %v4264_v49, 16  ;;  %v411_v8 = vshll.u32 %v4264_v49, 16 }
  0x72   : > { %3536 = vmatprep.mubr.msk.bf16.mxu0 %vm529_vm4, %v3200_v57  ;;  %v1383_v10 = vor.u32 %v1382_v61, %v1378_v54  ;;  %v1388_v13 = vrot.slane %v1386_v62, 5  ;;  %v417_v15 = vshll.u32 %v4269_v56, 16  ;;  %v421_v18 = vshrl.u32 %v4269_v56, 16  ;;  %v4310_v57 = vld [vmem:[%s4121_s27 + $0x40] sm:$0xf] }
  0x73   : > { %v406_v21 = vsel %vm4160_vm3, %v401_v0, %v405_v45  ;;  %v1374_v22 = vrot.slane %v1373_v1, 4  ;;  %v410_v23 = vrot.slane %v408_v3, 4  ;;  %v413_v26 = vrot.slane %v411_v8, 5  ;;  %v4318_v8 = vld [vmem:[%s4121_s27 + $0x44] sm:$0x1] }
  0x74   : > { %v3087_v31 = vcombine.low %v396_v59, %v406_v21  ;;  %v1384_v24 = vrot.slane %v1383_v10, 4  ;;  %v419_v32 = vrot.slane %v417_v15, 5  ;;  %v423_v34 = vrot.slane %v421_v18, 4 }
  0x75   : > { %v1379_v36 = vsel %vm4160_vm3, %v1374_v22, %v1378_v54  ;;  %v414_v37 = vor.u32 %v413_v26, %v410_v23  ;;  %v427_v38 = vshll.u32 %v4275_v63, 16  ;;  %v1391_v40 = vshrl.u32 %v3186_v9, 16  ;;  %v3189_v22 = vld [vmem:[%s4121_s27 + $0x48] sm:$0xf]  ;;  %v4327_v23 = vld [vmem:[%s4121_s27 + $0x4c] sm:$0xf] }
  0x76   : > { %3465 = vmatmul.mubr.msk.bf16.gmra.mrb[4].mxu1 %vm529_vm4, %v3087_v31  ;;  %v1389_v42 = vsel %vm4160_vm3, %v1384_v24, %v1388_v13  ;;  %v424_v43 = vor.u32 %v423_v34, %v419_v32  ;;  %v1394_v45 = vshll.u32 %v3186_v9, 16  ;;  %v1400_v47 = vshll.u32 %v4288_v30, 16 }
  0x77   : > { %v3201_v50 = vcombine.low %v1379_v36, %v1389_v42  ;;  %v415_v51 = vrot.slane %v414_v37, 4  ;;  %v429_v52 = vrot.slane %v427_v38, 5  ;;  %v1393_v54 = vrot.slane %v1391_v40, 4 }
  0x78   : > { %v425_v59 = vrot.slane %v424_v43, 4  ;;  %v1396_v61 = vrot.slane %v1394_v45, 5  ;;  %v1402_v62 = vrot.slane %v1400_v47, 5  ;;  %v1404_v0 = vshrl.u32 %v4288_v30, 16  ;;  %v4333_v43 = vld [vmem:[%s4121_s27 + $0x50] sm:$0x1] }
  0x79   : > { %3537 = vmatmul.mubr.msk.bf16.gmra.mrb[4].mxu0 %vm529_vm4, %v3201_v50  ;;  %v420_v1 = vsel %vm4160_vm3, %v415_v51, %v419_v32  ;;  %v1410_v3 = vshll.u32 %v4303_v44, 16  ;;  %v432_v9 = vshrl.u32 %v4307_v48, 16  ;;  %v435_v10 = vshll.u32 %v4307_v48, 16 }
  0x7a   : > { %v430_v13 = vsel %vm4160_vm3, %v425_v59, %v429_v52  ;;  %v1397_v15 = vor.u32 %v1396_v61, %v1393_v54  ;;  %v1406_v18 = vrot.slane %v1404_v0, 4  ;;  %v441_v21 = vshll.u32 %v4310_v57, 16  ;;  %v4339_v59 = vld [vmem:[%s4121_s27 + $0x48] sm:$0xf] }
  0x7b   : > { %v3088_v26 = vcombine.low %v420_v1, %v430_v13  ;;  %v1412_v31 = vrot.slane %v1410_v3, 5  ;;  %v434_v24 = vrot.slane %v432_v9, 4  ;;  %v437_v32 = vrot.slane %v435_v10, 5 }
  0x7c   : > { %v1398_v34 = vrot.slane %v1397_v15, 4  ;;  %v1407_v36 = vor.u32 %v1406_v18, %v1402_v62  ;;  %v443_v37 = vrot.slane %v441_v21, 5  ;;  %v445_v38 = vshrl.u32 %v4310_v57, 16 }
  0x7d   : > { %3468 = vmatprep.mubr.msk.bf16.mxu1 %vm529_vm4, %v3088_v26  ;;  %v438_v40 = vor.u32 %v437_v32, %v434_v24  ;;  %v451_v42 = vshll.u32 %v4318_v8, 16  ;;  %v1415_v45 = vshrl.u32 %v3189_v22, 16  ;;  %v1418_v47 = vshll.u32 %v3189_v22, 16  ;;  %v4351_v24 = vld [vmem:[%s4121_s27 + $0x50] sm:$0x1] }
  0x7e   : > { %v1403_v50 = vsel %vm4160_vm3, %v1398_v34, %v1402_v62  ;;  %v1408_v51 = vrot.slane %v1407_v36, 4  ;;  %v447_v52 = vrot.slane %v445_v38, 4  ;;  %v1424_v54 = vshll.u32 %v4327_v23, 16  ;;  %v4345_v62 = vld [vmem:[%s4121_s27 + $0x4c] sm:$0xf] }
  0x7f   : > { %v439_v61 = vrot.slane %v438_v40, 4  ;;  %v453_v0 = vrot.slane %v451_v42, 5  ;;  %v1417_v1 = vrot.slane %v1415_v45, 4  ;;  %v1420_v3 = vrot.slane %v1418_v47, 5  ;;  %v3192_v38 = vld [vmem:[%s4121_s27 + $0x54] sm:$0xf] }
  0x80   : > { %v1413_v9 = vsel %vm4160_vm3, %v1408_v51, %v1412_v31  ;;  %v448_v10 = vor.u32 %v447_v52, %v443_v37  ;;  %v1426_v13 = vrot.slane %v1424_v54, 5  ;;  %v1428_v15 = vshrl.u32 %v4327_v23, 16  ;;  %v4362_v54 = vld [vmem:[%s4121_s27 + $0x58] sm:$0xf] }
  0x81   : > { %v3202_v18 = vcombine.low %v1403_v50, %v1413_v9  ;;  %v444_v21 = vsel %vm4160_vm3, %v439_v61, %v443_v37  ;;  %v1421_v22 = vor.u32 %v1420_v3, %v1417_v1  ;;  %v1434_v26 = vshll.u32 %v4333_v43, 16 }
  0x82   : > { %v449_v32 = vrot.slane %v448_v10, 4  ;;  %v1430_v34 = vrot.slane %v1428_v15, 4  ;;  %v456_v31 = vshrl.u32 %v4339_v59, 16  ;;  %v459_v36 = vshll.u32 %v4339_v59, 16  ;;  %v4367_v10 = vld [vmem:[%s4121_s27 + $0x5c] sm:$0x1] }
  0x83   : > { %3540 = vmatprep.mubr.msk.bf16.mxu0 %vm529_vm4, %v3202_v18  ;;  %v1422_v40 = vrot.slane %v1421_v22, 4  ;;  %v1436_v42 = vrot.slane %v1434_v26, 5  ;;  %v465_v37 = vshll.u32 %v4345_v62, 16  ;;  %v469_v45 = vshrl.u32 %v4345_v62, 16  ;;  %v4370_v15 = vld [vmem:[%s4121_s27 + $0x54] sm:$0xf] }
  0x84   : > { %v454_v47 = vsel %vm4160_vm3, %v449_v32, %v453_v0  ;;  %v1431_v50 = vor.u32 %v1430_v34, %v1426_v13  ;;  %v458_v51 = vrot.slane %v456_v31, 4  ;;  %v461_v52 = vrot.slane %v459_v36, 5  ;;  %5033 = vst [vmem:[#allocation9_spill] sm:$0xff] %v4370_v15  ;;  %v4374_v32 = vld [vmem:[%s4121_s27 + $0x58] sm:$0xf] }
  0x85   : > { %v3089_v61 = vcombine.low %v444_v21, %v454_v47  ;;  %v1427_v1 = vsel %vm4160_vm3, %v1422_v40, %v1426_v13  ;;  %v467_v3 = vrot.slane %v465_v37, 5  ;;  %v471_v9 = vrot.slane %v469_v45, 4  ;;  %5034 = vst [vmem:[#allocation10_spill] sm:$0xff] %v4374_v32 }
  0x86   : > { %v1432_v18 = vrot.slane %v1431_v50, 4  ;;  %v462_v22 = vor.u32 %v461_v52, %v458_v51  ;;  %v475_v26 = vshll.u32 %v4351_v24, 16  ;;  %v1439_v0 = vshrl.u32 %v3192_v38, 16 }
  0x87   : > { %3469 = vmatmul.mubr.msk.bf16.gmra.mrb[8].mxu1 %vm529_vm4, %v3089_v61  ;;  %v472_v21 = vor.u32 %v471_v9, %v467_v3  ;;  %v1442_v34 = vshll.u32 %v3192_v38, 16  ;;  %v1448_v13 = vshll.u32 %v4362_v54, 16  ;;  %v1452_v31 = vshrl.u32 %v4362_v54, 16  ;;  %v4382_v61 = vld [vmem:[%s4121_s27 + $0x5c] sm:$0x1] }
  0x88   : > { %v1437_v36 = vsel %vm4160_vm3, %v1432_v18, %v1436_v42  ;;  %v463_v40 = vrot.slane %v462_v22, 4  ;;  %v477_v37 = vrot.slane %v475_v26, 5  ;;  %v1441_v45 = vrot.slane %v1439_v0, 4  ;;  %5035 = vst [vmem:[#allocation11_spill] sm:$0xff] %v4382_v61  ;;  %v3195_v38 = vld [vmem:[%s4121_s27 + $0x60] sm:$0xf] }
  0x89   : > { %v3203_v47 = vcombine.low %v1427_v1, %v1437_v36  ;;  %v473_v50 = vrot.slane %v472_v21, 4  ;;  %v1444_v51 = vrot.slane %v1442_v34, 5  ;;  %v1450_v52 = vrot.slane %v1448_v13, 5  ;;  %v4395_v26 = vld [vmem:[%s4121_s27 + $0x64] sm:$0xf] }
  0x8a   : > { %v468_v9 = vsel %vm4160_vm3, %v463_v40, %v467_v3  ;;  %v1454_v17 = vrot.slane %v1452_v31, 4  ;;  %v1458_v12 = vshll.u32 %v4367_v10, 16  ;;  %v480_v25 = vshrl.u32 %v4370_v15, 16 }
  0x8b   : > { %3541 = vmatmul.mubr.msk.bf16.gmra.mrb[8].mxu0 %vm529_vm4, %v3203_v47  ;;  %v478_v42 = vsel %vm4160_vm3, %v473_v50, %v477_v37  ;;  %v1445_v1 = vor.u32 %v1444_v51, %v1441_v45  ;;  %v483_v18 = vshll.u32 %v4370_v15, 16  ;;  %v489_v22 = vshll.u32 %v4374_v32, 16 }
  0x8c   : > { %v3090_v0 = vcombine.low %v468_v9, %v478_v42  ;;  %v1455_v3 = vor.u32 %v1454_v17, %v1450_v52  ;;  %v1460_v21 = vrot.slane %v1458_v12, 5  ;;  %v482_v34 = vrot.slane %v480_v25, 4  ;;  %v4403_v12 = vld [vmem:[%s4121_s27 + $0x68] sm:$0x1] }
  0x8d   : > { %v1446_v13 = vrot.slane %v1445_v1, 4  ;;  %v485_v31 = vrot.slane %v483_v18, 5  ;;  %v491_v36 = vrot.slane %v489_v22, 5  ;;  %v493_v40 = vshrl.u32 %v4374_v32, 16  ;;  %v4409_v32 = vld [vmem:[#allocation2 + $0x4] sm:$0x3] }
  0x8e   : > { %3472 = vmatprep.mubr.msk.bf16.mxu1 %vm529_vm4, %v3090_v0  ;;  %v1456_v37 = vrot.slane %v1455_v3, 4  ;;  %v499_v45 = vshll.u32 %v4382_v61, 16  ;;  %v1463_v47 = vshrl.u32 %v3195_v38, 16  ;;  %v1466_v50 = vshll.u32 %v3195_v38, 16  ;;  %v3214_v0 = vld [vmem:[%s4121_s27 + $0xc] sm:$0xe] }
  0x8f   : > { %v1451_v51 = vsel %vm4160_vm3, %v1446_v13, %v1450_v52  ;;  %v486_v9 = vor.u32 %v485_v31, %v482_v34  ;;  %v495_v17 = vrot.slane %v493_v40, 4  ;;  %v1472_v25 = vshll.u32 %v4395_v26, 16 }
  0x90   : > { %v1461_v42 = vsel %vm4160_vm3, %v1456_v37, %v1460_v21  ;;  %v501_v1 = vrot.slane %v499_v45, 5  ;;  %v1465_v18 = vrot.slane %v1463_v47, 4  ;;  %v1468_v22 = vrot.slane %v1466_v50, 5 }
  0x91   : > { %v3204_v3 = vcombine.low %v1451_v51, %v1461_v42  ;;  %v487_v15 = vrot.slane %v486_v9, 4  ;;  %v496_v61 = vor.u32 %v495_v17, %v491_v36  ;;  %v1474_v38 = vrot.slane %v1472_v25, 5 }
  0x92   : > { %v1469_v52 = vor.u32 %v1468_v22, %v1465_v18  ;;  %v1476_v34 = vshrl.u32 %v4395_v26, 16  ;;  %v1482_v13 = vshll.u32 %v4403_v12, 16  ;;  %v720_v31 = vsel %vm554_vm0, %v4283_v20, 0 }
  0x93   : > { %3544 = vmatprep.mubr.msk.bf16.mxu0 %vm529_vm4, %v3204_v3  ;;  %v492_v40 = vsel %vm4160_vm3, %v487_v15, %v491_v36  ;;  %v497_v37 = vrot.slane %v496_v61, 4  ;;  %3477 = vmatpush3.bf16.msra.mxu1 %v720_v31  ;;  %v3222_v45 = vrot.slane %v3214_v0, 9  ;;  %v5038_v47 = vrot.slane %v4145_v14, 5 }
  0x94   : > { %v1470_v20 = vrot.slane %v1469_v52, 4  ;;  %v1478_v51 = vrot.slane %v1476_v34, 4  ;;  %v3100_v9 = vcombine.low %v4130_v5, %v4133_v6  ;;  %v3101_v17 = vcombine.low %v4156_v28, %v4165_v33  ;;  %3770 = vmatprep.subr.msk.bf16.mxu1 %vm554_vm0, %v4409_v32  ;;  %v3215_v28 = vld [vmem:[%s4121_s27 + $0x18] sm:$0xe] }
  0x95   : > { %v1688_v50 = vrot.slane %v5038_v47, 4  ;;  %v1693_v15 = vrot.slane %v4181_v55, 5  ;;  %v502_v61 = vsel %vm4160_vm3, %v497_v37, %v501_v1  ;;  %v5039_v36 = vmov %v5038_v47  ;;  %v3216_v1 = vld [vmem:[%s4121_s27 + $0x24] sm:$0xe] }
  0x96   : > { %v1687_v25 = vsel %vm4417_vm7, %v3222_v45, %v5039_v36  ;;  %v5040_v42 = vrot.slane %v4150_v19, 5  ;;  %v3091_v18 = vcombine.low %v492_v40, %v502_v61  ;;  %v1479_v22 = vor.u32 %v1478_v51, %v1474_v38  ;;  %v3217_v40 = vld [vmem:[%s4121_s27 + $0x30] sm:$0xe] }
  0x97   : > { %v1484_v0 = vrot.slane %v1482_v13, 5  ;;  %v1696_v55 = vrot.slane %v4187_v58, 5  ;;  %v1475_v14 = vsel %vm4160_vm3, %v1470_v20, %v1474_v38  ;;  %v3223_v19 = vrot.slane %v3215_v28, 9  ;;  %v3218_v38 = vld [vmem:[%s4121_s27 + $0x3c] sm:$0xe] }
  0x98   : > { %v1690_v5 = vsel %vm4417_vm7, %v1688_v50, %v5040_v42  ;;  %3473 = vmatmul.mubr.msk.bf16.gmra.mrb[12].mxu1 %vm529_vm4, %v3091_v18  ;;  %v1480_v52 = vrot.slane %v1479_v22, 4  ;;  %v1700_v34 = vrot.slane %v4218_v2, 5  ;;  %v1695_v31 = vrot.slane %v1693_v15, 4 }
  0x99   : > { %v3230_v3 = vcombine.low %v1687_v25, %v1690_v5  ;;  %3478 = vmatprep.mubr.msk.bf16.mxu1 %vm529_vm4, %v3100_v9  ;;  %v1707_v13 = vrot.slane %v4251_v27, 5  ;;  %v3224_v37 = vrot.slane %v3216_v1, 9  ;;  %v1703_v50 = vrot.slane %v4225_v46, 5  ;;  %v3219_v25 = vld [vmem:[%s4121_s27 + $0x48] sm:$0xe] }
  0x9a   : > { %v1485_v58 = vsel %vm4160_vm3, %v1480_v52, %v1484_v0  ;;  %v1702_v47 = vrot.slane %v1700_v34, 4  ;;  %v851_v20 = vrot.slane %v4136_v7, 5  ;;  %v1694_v2 = vsel %vm4417_vm7, %v3223_v19, %v1693_v15  ;;  %v3220_v5 = vld [vmem:[%s4121_s27 + $0x54] sm:$0xe]  ;;  %v4497_v19 = vld [vmem:[#allocation2 + $0x6] sm:$0x3] }
  0x9b   : > { %v3205_v45 = vcombine.low %v1475_v14, %v1485_v58  ;;  %v3225_v51 = vrot.slane %v3217_v40, 9  ;;  %v1714_v9 = vrot.slane %v4288_v30, 5  ;;  %v1697_v27 = vsel %vm4417_vm7, %v1695_v31, %v1696_v55  ;;  %v820_v55 = vld [vmem:[%s4121_s27 + $0xc] sm:$0xe] }
  0x9c   : > { %v3102_v61 = vcombine.low %v4195_v11, %v4200_v16  ;;  %v1709_v36 = vrot.slane %v1707_v13, 4  ;;  %v1710_v46 = vrot.slane %v4259_v41, 5  ;;  %v1701_v15 = vsel %vm4417_vm7, %v3224_v37, %v1700_v34 }
  0x9d   : > { %3545 = vmatmul.mubr.msk.bf16.gmra.mrb[12].mxu0 %vm529_vm4, %v3205_v45  ;;  %v3226_v42 = vrot.slane %v3218_v38, 9  ;;  %v1721_v30 = vrot.slane %v4327_v23, 5  ;;  %v1704_v28 = vsel %vm4417_vm7, %v1702_v47, %v1703_v50  ;;  %v1716_v18 = vrot.slane %v1714_v9, 4 }
  0x9e   : > { %3550 = vmatprep.mubr.msk.bf16.mxu0 %vm529_vm4, %v3230_v3  ;;  %v1717_v11 = vrot.slane %v4303_v44, 5  ;;  %v1728_v22 = vrot.slane %v4362_v54, 5  ;;  %v855_v41 = vrot.slane %v4165_v33, 5  ;;  %v858_v0 = vrot.slane %v4168_v39, 5 }
  0x9f   : > { %v3231_v3 = vcombine.low %v1694_v2, %v1697_v27  ;;  %v4482_v23 = vsel %vm4417_vm7, %v3225_v51, %v1707_v13  ;;  %v4488_v44 = vsel %vm4417_vm7, %v1709_v36, %v1710_v46  ;;  %v3227_v54 = vrot.slane %v3219_v25, 9  ;;  %v4503_v13 = vld [vmem:[%s4121_s27 + $0x60] sm:$0xe]  ;;  %v823_v46 = vld [vmem:[%s4121_s27 + $0x30] sm:$0xe] }
  0xa0   : > { %3479 = vmatmul.mubr.msk.bf16.vlgmr.msra.gmra.mrb[0].mxu1 %vm529_vm4, %v3101_v17  ;;  %v1723_v1 = vrot.slane %v1721_v30, 4  ;;  %v1724_v33 = vrot.slane %v4333_v43, 5  ;;  %v1993_v39 = vsel %vm554_vm0, %v4292_v35, 0  ;;  %v3232_v17 = vcombine.low %v1701_v15, %v1704_v28  ;;  %v819_v51 = vld [vmem:[%s4121_s27] sm:$0xe] }
  0xa1   : > { %3482 = vmatprep.mubr.msk.bf16.mxu1 %vm529_vm4, %v3102_v61  ;;  %v4495_v14 = vsel %vm4417_vm7, %v3226_v42, %v1714_v9  ;;  %v3228_v52 = vrot.slane %v3220_v5, 9  ;;  %v1718_v34 = vsel %vm4417_vm7, %v1716_v18, %v1717_v11  ;;  %v1730_v31 = vrot.slane %v1728_v22, 4  ;;  %v822_v9 = vld [vmem:[%s4121_s27 + $0x24] sm:$0xe] }
  0xa2   : > { %v1731_v40 = vrot.slane %v4367_v10, 5  ;;  %v953_v43 = vsel %vm554_vm0, %v4409_v32, 0  ;;  %v3103_v35 = vcombine.low %v4231_v53, %v4234_v60  ;;  %v3233_v58 = vcombine.low %v4482_v23, %v4488_v44  ;;  %v4515_v10 = vld [vmem:[#allocation2 + $0xe] sm:$0x3] }
  0xa3   : > { %v3104_v37 = vcombine.low %v4264_v49, %v4269_v56  ;;  %v3105_v45 = vcombine.low %v4307_v48, %v4310_v57  ;;  %3495 = vmatpush3.bf16.msra.mxu1 %v953_v43  ;;  %v4520_v32 = vsel %vm4417_vm7, %v3227_v54, %v1721_v30  ;;  %v4524_v53 = vsel %vm4417_vm7, %v1723_v1, %v1724_v33  ;;  %v824_v30 = vld [vmem:[%s4121_s27 + $0x3c] sm:$0xe] }
  0xa4   : > { %v3117_v47 = vrot.slane %v820_v55, 9  ;;  %v857_v49 = vrot.slane %v855_v41, 4  ;;  %3771 = vmatprep.subr.msk.bf16.mxu1 %vm554_vm0, %v4497_v19  ;;  %v3234_v48 = vcombine.low %v4495_v14, %v1718_v34  ;;  %v3106_v50 = vcombine.low %v4339_v59, %v4345_v62 }
  0xa5   : > { %3551 = vmatmul.mubr.msk.bf16.vlgmr.msra.gmra.mrb[0].mxu0 %vm529_vm4, %v3231_v3  ;;  %v4534_v38 = vsel %vm4417_vm7, %v3228_v52, %v1728_v22  ;;  %v3229_v2 = vrot.slane %v4503_v13, 9  ;;  %v4541_v27 = vsel %vm4417_vm7, %v1730_v31, %v1731_v40  ;;  %v848_v61 = vrot.slane %v4133_v6, 5 }
  0xa6   : > { %3567 = vmatpush3.bf16.msra.mxu0 %v1993_v39  ;;  %3554 = vmatprep.mubr.msk.bf16.mxu0 %vm529_vm4, %v3232_v17  ;;  %v4548_v59 = vsel %vm4417_vm7, %v3117_v47, %v855_v41  ;;  %v4552_v36 = vsel %vm4417_vm7, %v857_v49, %v858_v0  ;;  %v3235_v25 = vcombine.low %v4520_v32, %v4524_v53  ;;  %v1735_v6 = vrot.slane %v4395_v26, 5  ;;  %v825_v0 = vld [vmem:[%s4121_s27 + $0x48] sm:$0xe] }
  0xa7   : > { %3775 = vmatprep.subr.msk.bf16.mxu0 %vm554_vm0, %v4515_v10  ;;  %v1738_v15 = vrot.slane %v4403_v12, 5  ;;  %v3125_v42 = vcombine.low %v4548_v59, %v4552_v36  ;;  %v3116_v5 = vrot.slane %v819_v51, 9  ;;  %v3119_v28 = vrot.slane %v822_v9, 9  ;;  %v821_v51 = vld [vmem:[%s4121_s27 + $0x18] sm:$0xe]  ;;  %v5043_v9 = vld [vmem:[#allocation9_spill] sm:$0xff] }
  0xa8   : > { %3483 = vmatmul.mubr.msk.bf16.gmra.mrb[4].mxu1 %vm529_vm4, %v3103_v35  ;;  %v869_v18 = vrot.slane %v4234_v60, 5  ;;  %v872_v11 = vrot.slane %v4240_v4, 5  ;;  %v3236_v22 = vcombine.low %v4534_v38, %v4541_v27  ;;  %v3120_v41 = vrot.slane %v823_v46, 9  ;;  %v5041_v35 = vld [vmem:[#allocation10_spill] sm:$0xff] }
  0xa9   : > { %3486 = vmatprep.mubr.msk.bf16.mxu1 %vm529_vm4, %v3104_v37  ;;  %v876_v26 = vrot.slane %v4269_v56, 5  ;;  %v879_v12 = vrot.slane %v4275_v63, 5  ;;  %v850_v3 = vrot.slane %v848_v61, 4  ;;  %v3121_v44 = vrot.slane %v824_v30, 9  ;;  %v826_v56 = vld [vmem:[%s4121_s27 + $0x54] sm:$0xe] }
  0xaa   : > { %v4573_v23 = vsel %vm4417_vm7, %v3119_v28, %v869_v18  ;;  %v871_v55 = vrot.slane %v869_v18, 4  ;;  %v883_v54 = vrot.slane %v4310_v57, 5  ;;  %v886_v1 = vrot.slane %v4318_v8, 5  ;;  %v5042_v37 = vld [vmem:[#allocation11_spill] sm:$0xff]  ;;  %v5044_v18 = vld [vmem:[#allocation8_spill] sm:$0xff] }
  0xab   : > { %v4577_v60 = vsel %vm4417_vm7, %v3120_v41, %v876_v26  ;;  %v878_v4 = vrot.slane %v876_v26, 4  ;;  %v3122_v33 = vrot.slane %v825_v0, 9  ;;  %v890_v39 = vrot.slane %v4345_v62, 5  ;;  %v3280_v41 = vld [vmem:[%s4121_s27 + $0x18] sm:$0xf]  ;;  %v3852_v26 = vld [vmem:[%s4121_s27 + $0x24] sm:$0xff]  }
  0xac   : > { %v4585_v63 = vsel %vm4417_vm7, %v871_v55, %v872_v11  ;;  %v893_v17 = vrot.slane %v4351_v24, 5  ;;  %v4598_v8 = vsel %vm4417_vm7, %v3121_v44, %v883_v54  ;;  %v885_v52 = vrot.slane %v883_v54, 4  ;;  %v4671_v0 = vld [vmem:[%s4121_s27 + $0x1c] sm:$0xf]  ;;  %v4679_v54 = vld [vmem:[%s4121_s27 + $0x28] sm:$0xf] }
  0xad   : > { %3555 = vmatmul.mubr.msk.bf16.gmra.mrb[4].mxu0 %vm529_vm4, %v3233_v58  ;;  %v3127_v14 = vcombine.low %v4573_v23, %v4585_v63  ;;  %v4594_v57 = vsel %vm4417_vm7, %v878_v4, %v879_v12  ;;  %v4604_v62 = vsel %vm4417_vm7, %v3122_v33, %v890_v39  ;;  %v892_v24 = vrot.slane %v890_v39, 4  ;;  %v3853_v12 = vld [vmem:[%s4121_s27 + $0x30] sm:$0xff]  }
  0xae   : > { %3558 = vmatprep.mubr.msk.bf16.mxu0 %vm529_vm4, %v3234_v48  ;;  %v3128_v34 = vcombine.low %v4577_v60, %v4594_v57  ;;  %v3123_v31 = vrot.slane %v826_v56, 9  ;;  %v1737_v40 = vrot.slane %v1735_v6, 4  ;;  %v4609_v43 = vsel %vm4417_vm7, %v885_v52, %v886_v1  ;;  %v4675_v4 = vld [vmem:[#allocation2 + $0x10] sm:$0x3]  ;;  %v4711_v60 = vld [vmem:[%s4121_s27 + $0x2c] sm:$0x1] }
  0xaf   : > { %v897_v58 = vrot.slane %v5041_v35, 5  ;;  %v900_v32 = vrot.slane %v5042_v37, 5  ;;  %v849_v53 = vsel %vm4417_vm7, %v3116_v5, %v848_v61  ;;  %v862_v47 = vrot.slane %v4200_v16, 5 }
  0xb0   : > { %3487 = vmatmul.mubr.msk.bf16.gmra.mrb[8].mxu1 %vm529_vm4, %v3105_v45  ;;  %v3129_v49 = vcombine.low %v4598_v8, %v4609_v43  ;;  %v4621_v45 = vsel %vm4417_vm7, %v892_v24, %v893_v17  ;;  %v852_v48 = vsel %vm4417_vm7, %v850_v3, %v851_v20  ;;  %v3107_v27 = vcombine.low %v5043_v9, %v5041_v35  ;;  %v3854_v17 = vld [vmem:[%s4121_s27 + $0x3c] sm:$0xff]  }
  0xb1   : > { %3490 = vmatprep.mubr.msk.bf16.mxu1 %vm529_vm4, %v3106_v50  ;;  %v3130_v50 = vcombine.low %v4604_v62, %v4621_v45  ;;  %v4631_v38 = vsel %vm4417_vm7, %v3123_v31, %v897_v58  ;;  %v899_v16 = vrot.slane %v897_v58, 4  ;;  %v1736_v7 = vsel %vm4417_vm7, %v3229_v2, %v1735_v6  ;;  %v3851_v2 = vld [vmem:[%s4121_s27 + $0x18] sm:$0xff]   ;;  %v3855_v31 = vld [vmem:[%s4121_s27 + $0x48] sm:$0xff]   ;;  %v3286_v58 = vld [vmem:[%s4121_s27 + $0x30] sm:$0xf] }
  0xb2   : > { %v3124_v20 = vcombine.low %v849_v53, %v852_v48  ;;  %v1739_v30 = vsel %vm4417_vm7, %v1737_v40, %v1738_v15  ;;  %v3118_v5 = vrot.slane %v821_v51, 9  ;;  %v864_v28 = vrot.slane %v862_v47, 4  ;;  %v4702_v40 = vld [vmem:[%s4121_s27 + $0x20] sm:$0x1]  ;;  %v3856_v51 = vld [vmem:[%s4121_s27 + $0x54] sm:$0xff]  }
  0xb3   : > { %v4638_v61 = vsel %vm4417_vm7, %v899_v16, %v900_v32  ;;  %v3237_v13 = vcombine.low %v1736_v7, %v1739_v30  ;;  %v2133_v3 = vshrl.u32 %v3280_v41, 16  ;;  %v2136_v55 = vshll.u32 %v3280_v41, 16  ;;  %v3289_v30 = vld [vmem:[%s4121_s27 + $0x3c] sm:$0xf] }
  0xb4   : > { %v3131_v46 = vcombine.low %v4631_v38, %v4638_v61  ;;  %v863_v6 = vsel %vm4417_vm7, %v3118_v5, %v862_v47  ;;  %v2375_v44 = vsel %vm554_vm0, %v4515_v10, 0  ;;  %v2142_v59 = vshll.u32 %v4671_v0, 16  ;;  %v3857_v5 = vld [vmem:[%s4121_s27 + $0x60] sm:$0xff]   ;;  %v3295_v61 = vld [vmem:[%s4121_s27 + $0x54] sm:$0xf] }
  0xb5   : > { %3559 = vmatmul.mubr.msk.bf16.gmra.mrb[8].mxu0 %vm529_vm4, %v3235_v25  ;;  %v865_v25 = vrot.slane %v5044_v18, 5  ;;  %v2146_v36 = vshrl.u32 %v4671_v0, 16  ;;  %v2138_v10 = vrot.slane %v2136_v55, 5  ;;  %v2166_v33 = vshll.u32 %v4679_v54, 16  ;;  %v4732_v18 = vld [vmem:[%s4121_s27 + $0x40] sm:$0xf] }
  0xb6   : > { %3562 = vmatprep.mubr.msk.bf16.mxu0 %vm529_vm4, %v3236_v22  ;;  %v1155_v22 = vsel %vm554_vm0, %v4497_v19, 0  ;;  %v3283_v19 = vld [vmem:[%s4121_s27 + $0x24] sm:$0xf]  ;;  %v2170_v39 = vshrl.u32 %v4679_v54, 16  ;;  %v4698_v52 = vrot.slane %v2142_v59, 5  ;;  %v2181_v53 = vshrl.u32 %v3286_v58, 16 }
  0xb7   : > { %v866_v11 = vsel %vm4417_vm7, %v864_v28, %v865_v25  ;;  %v2157_v1 = vshrl.u32 %v3283_v19, 16  ;;  %v2160_v56 = vshll.u32 %v3283_v19, 16  ;;  %v2148_v24 = vrot.slane %v2146_v36, 4  ;;  %v4729_v28 = vld [vmem:[%s4121_s27 + $0x38] sm:$0x1] }
  0xb8   : > { %3491 = vmatmul.mubr.msk.bf16.gmra.mrb[12].mxu1 %vm529_vm4, %v3107_v27  ;;  %v3126_v15 = vcombine.low %v863_v6, %v866_v11  ;;  %v4705_v23 = vrot.slane %v2166_v33, 5  ;;  %v2172_v63 = vrot.slane %v2170_v39, 4  ;;  %v2184_v47 = vshll.u32 %v3286_v58, 16  ;;  %v3292_v11 = vld [vmem:[%s4121_s27 + $0x48] sm:$0xf] }
  0xb9   : > { %3496 = vmatprep.mubr.msk.bf16.mxu1 %vm529_vm4, %v3124_v20  ;;  %v2159_v37 = vrot.slane %v2157_v1, 4  ;;  %v2162_v32 = vrot.slane %v2160_v56, 5  ;;  %v2149_v57 = vor.u32 %v2148_v24, %v4698_v52  ;;  %v2176_v20 = vshll.u32 %v4711_v60, 16 }
  0xba   : > { %v2173_v7 = vor.u32 %v2172_v63, %v4705_v23  ;;  %v2186_v6 = vrot.slane %v2184_v47, 5  ;;  %v2205_v43 = vshrl.u32 %v3289_v30, 16  ;;  %v2232_v55 = vshll.u32 %v3292_v11, 16 }
  0xbb   : > { %v2163_v27 = vor.u32 %v2162_v32, %v2159_v37  ;;  %v2150_v25 = vrot.slane %v2149_v57, 4  ;;  %v2200_v59 = vshll.u32 %v4729_v28, 16  ;;  %v3858_v32 = vld [vmem:[%s4121_s27 + $0x6c] sm:$0xff]  }
  0xbc   : > { %v2174_v45 = vrot.slane %v2173_v7, 4  ;;  %v2207_v56 = vrot.slane %v2205_v43, 4  ;;  %v2234_v37 = vrot.slane %v2232_v55, 5 }
  0xbd   : > { %3563 = vmatmul.mubr.msk.bf16.gmra.mrb[12].mxu0 %vm529_vm4, %v3237_v13  ;;  %v2164_v62 = vrot.slane %v2163_v27, 4  ;;  %v2202_v63 = vrot.slane %v2200_v59, 5 }
  0xbe   : > { %3568 = vmatprep.mubr.msk.bf16.mxu0 %vm529_vm4, %v3851_v2  ;;  %v2183_v2 = vrot.slane %v2181_v53, 4 }
  0xbf   : > { %v2169_v39 = vsel %vm4160_vm3, %v2164_v62, %v4705_v23 }
  0xc0   : > { %3497 = vmatmul.mubr.msk.bf16.vlgmr.msra.gmra.mrb[0].mxu1 %vm529_vm4, %v3125_v42  ;;  %v2135_v42 = vrot.slane %v2133_v3, 4  ;;  %v2229_v3 = vshrl.u32 %v3292_v11, 16 }
  0xc1   : > { %3500 = vmatprep.mubr.msk.bf16.mxu1 %vm529_vm4, %v3126_v15  ;;  %3513 = vmatpush3.bf16.msra.mxu1 %v1155_v22  ;;  %v4742_v22 = vld [vmem:[%s4121_s27 + $0x4c] sm:$0xf] }
  0xc2   : > { %v2139_v35 = vor.u32 %v2138_v10, %v2135_v42  ;;  %v2238_v36 = vshll.u32 %v4742_v22, 16  ;;  %v2242_v42 = vshrl.u32 %v4742_v22, 16  ;;  %v2187_v10 = vor.u32 %v2186_v6, %v2183_v2 }
  0xc3   : > { %v2231_v58 = vrot.slane %v2229_v3, 4  ;;  %v2256_v2 = vshll.u32 %v3295_v61, 16 }
  0xc4   : > { %v2140_v9 = vrot.slane %v2139_v35, 4  ;;  %v4773_v35 = vld [vmem:[%s4121_s27 + $0x50] sm:$0x1]  ;;  %v4777_v57 = vrot.slane %v2238_v36, 5  ;;  %v2244_v38 = vrot.slane %v2242_v42, 4  ;;  %v2629_v42 = vsel %vm554_vm0, %v4675_v4, 0 }
  0xc5   : > { %3569 = vmatmul.mubr.msk.bf16.vlgmr.msra.gmra.mrb[0].mxu0 %vm529_vm4, %v3852_v26  ;;  %v2214_v26 = vshll.u32 %v4732_v18, 16  ;;  %v2235_v27 = vor.u32 %v2234_v37, %v2231_v58  ;;  %v2248_v7 = vshll.u32 %v4773_v35, 16  ;;  %v4813_v58 = vld [vmem:[%s4121_s27 + $0x70] sm:$0xf] }
  0xc6   : > { %3585 = vmatpush3.bf16.msra.mxu0 %v2375_v44  ;;  %3572 = vmatprep.mubr.msk.bf16.mxu0 %vm529_vm4, %v3853_v12  ;;  %v2145_v41 = vsel %vm4160_vm3, %v2140_v9, %v4698_v52  ;;  %v2218_v12 = vshrl.u32 %v4732_v18, 16  ;;  %v3859_v44 = vld [vmem:[%s4121_s27 + $0xc] sm:$0xff]   ;;  %v4764_v52 = vld [vmem:[%s4121_s27 + $0x44] sm:$0x1] }
  0xc7   : > { %3776 = vmatprep.subr.msk.bf16.mxu0 %vm554_vm0, %v4675_v4  ;;  %v4770_v24 = vrot.slane %v2214_v26, 5  ;;  %v2224_v47 = vshll.u32 %v4764_v52, 16  ;;  %v2236_v3 = vrot.slane %v2235_v27, 4  ;;  %v2250_v55 = vrot.slane %v2248_v7, 5  ;;  %v3862_v37 = vld [vmem:[%s4121_s27 + $0x30] sm:$0xff]  }
  0xc8   : > { %3501 = vmatmul.mubr.msk.bf16.gmra.mrb[4].mxu1 %vm529_vm4, %v3127_v14  ;;  %v4708_v14 = vld [vmem:[%s4121_s27 + $0x34] sm:$0xf] }
  0xc9   : > { %3504 = vmatprep.mubr.msk.bf16.mxu1 %vm529_vm4, %v3128_v34  ;;  %v2152_v34 = vshll.u32 %v4702_v40, 16  ;;  %v2190_v48 = vshll.u32 %v4708_v14, 16  ;;  %v2194_v16 = vshrl.u32 %v4708_v14, 16  ;;  %v2241_v4 = vsel %vm4160_vm3, %v2236_v3, %v4777_v57 }
  0xcb   : > { %v2154_v13 = vrot.slane %v2152_v34, 5  ;;  %v4739_v15 = vrot.slane %v2190_v48, 5  ;;  %v2196_v8 = vrot.slane %v2194_v16, 4  ;;  %v4782_v48 = vld [vmem:[%s4121_s27 + $0x58] sm:$0xf] }
  0xcc   : > { %v3860_v16 = vld [vmem:[%s4121_s27 + $0x18] sm:$0xff]   ;;  %v2262_v6 = vshll.u32 %v4782_v48, 16  ;;  %v2266_v11 = vshrl.u32 %v4782_v48, 16 }
  0xcd   : > { %3573 = vmatmul.mubr.msk.bf16.gmra.mrb[4].mxu0 %vm529_vm4, %v3854_v17  ;;  %v2155_v19 = vsel %vm4160_vm3, %v2150_v25, %v2154_v13  ;;  %v2197_v1 = vor.u32 %v2196_v8, %v4739_v15  ;;  %v3861_v25 = vld [vmem:[%s4121_s27 + $0x24] sm:$0xff]   ;;  %v2245_v13 = vor.u32 %v2244_v38, %v4777_v57  ;;  %v3863_v38 = vld [vmem:[%s4121_s27 + $0x3c] sm:$0xff]   ;;  %v2314_v57 = vshrl.u32 %v4813_v58, 16 }
  0xce   : > { %3576 = vmatprep.mubr.msk.bf16.mxu0 %vm529_vm4, %v3855_v31  ;;  %v2220_v31 = vrot.slane %v2218_v12, 4  ;;  %v3304_v23 = vcombine.low %v2145_v41, %v2155_v19  ;;  %v2226_v41 = vrot.slane %v2224_v47, 5  ;;  %v2258_v19 = vrot.slane %v2256_v2, 5 }
  0xcf   : > { %v2198_v34 = vrot.slane %v2197_v1, 4  ;;  %v2264_v59 = vrot.slane %v2262_v6, 5  ;;  %v2268_v36 = vrot.slane %v2266_v11, 4  ;;  %v4809_v1 = vld [vmem:[%s4121_s27 + $0x5c] sm:$0x1] }
  0xd0   : > { %3505 = vmatmul.mubr.msk.bf16.gmra.mrb[8].mxu1 %vm529_vm4, %v3129_v49  ;;  %v2208_v49 = vshll.u32 %v3289_v30, 16  ;;  %v2221_v9 = vor.u32 %v2220_v31, %v4770_v24  ;;  %v3298_v30 = vld [vmem:[%s4121_s27 + $0x60] sm:$0xf] }
  0xd1   : > { %3508 = vmatprep.mubr.msk.bf16.mxu1 %vm529_vm4, %v3130_v50  ;;  %v2178_v50 = vrot.slane %v2176_v20, 5  ;;  %v2253_v20 = vshrl.u32 %v3295_v61, 16  ;;  %v2203_v43 = vsel %vm4160_vm3, %v2198_v34, %v2202_v63  ;;  %v2277_v62 = vshrl.u32 %v3298_v30, 16  ;;  %v4825_v63 = vld [vmem:[%s4121_s27 + $0x68] sm:$0x1] }
  0xd2   : > { %v2210_v33 = vrot.slane %v2208_v49, 5  ;;  %v2222_v12 = vrot.slane %v2221_v9, 4  ;;  %v2269_v34 = vor.u32 %v2268_v36, %v2264_v59  ;;  %v2524_v36 = vrot.slane %v4671_v0, 5 }
  0xd3   : > { %v2179_v17 = vsel %vm4160_vm3, %v2174_v45, %v2178_v50  ;;  %v2280_v45 = vshll.u32 %v3298_v30, 16 }
  0xd4   : > { %v2211_v53 = vor.u32 %v2210_v33, %v2207_v56  ;;  %v3301_v56 = vld [vmem:[%s4121_s27 + $0x6c] sm:$0xf]  ;;  %v2279_v33 = vrot.slane %v2277_v62, 4  ;;  %v4839_v62 = vld [vmem:[%s4121_s27 + $0x74] sm:$0x1] }
  0xd5   : > { %3577 = vmatmul.mubr.msk.bf16.gmra.mrb[8].mxu0 %vm529_vm4, %v3856_v51  ;;  %v3305_v51 = vcombine.low %v2169_v39, %v2179_v17  ;;  %v2282_v39 = vrot.slane %v2280_v45, 5  ;;  %v2304_v47 = vshll.u32 %v3301_v56, 16  ;;  %v3864_v45 = vld [vmem:[%s4121_s27 + $0x48] sm:$0xff]  }
  0xd6   : > { %3580 = vmatprep.mubr.msk.bf16.mxu0 %vm529_vm4, %v3857_v5  ;;  %v4789_v5 = vld [vmem:[%s4121_s27 + $0x64] sm:$0xf]  ;;  %v2212_v49 = vrot.slane %v2211_v53, 4  ;;  %v2272_v53 = vshll.u32 %v4809_v1, 16 }
  0xd7   : > { %v2286_v50 = vshll.u32 %v4789_v5, 16  ;;  %v2290_v26 = vshrl.u32 %v4789_v5, 16  ;;  %v2283_v9 = vor.u32 %v2282_v39, %v2279_v33  ;;  %v2306_v6 = vrot.slane %v2304_v47, 5 }
  0xd8   : > { %3509 = vmatmul.mubr.msk.bf16.gmra.mrb[12].mxu1 %vm529_vm4, %v3131_v46  ;;  %v2188_v46 = vrot.slane %v2187_v10, 4 }
  0xd9   : > { %3514 = vmatprep.mubr.msk.bf16.mxu1 %vm529_vm4, %v3859_v44  ;;  %v2246_v44 = vrot.slane %v2245_v13, 4  ;;  %v2288_v17 = vrot.slane %v2286_v50, 5  ;;  %v2292_v31 = vrot.slane %v2290_v26, 4  ;;  %v2274_v13 = vrot.slane %v2272_v53, 5  ;;  %v3865_v26 = vld [vmem:[%s4121_s27 + $0x54] sm:$0xff]  }
  0xda   : > { %v2193_v8 = vsel %vm4160_vm3, %v2188_v46, %v4739_v15  ;;  %v2255_v15 = vrot.slane %v2253_v20, 4 }
  0xdb   : > { %v3306_v10 = vcombine.low %v2193_v8, %v2203_v43  ;;  %v2251_v61 = vsel %vm4160_vm3, %v2246_v44, %v2250_v55  ;;  %v2293_v27 = vor.u32 %v2292_v31, %v2288_v17  ;;  %v2316_v8 = vrot.slane %v2314_v57, 4 }
  0xdc   : > { %v2259_v46 = vor.u32 %v2258_v19, %v2255_v15  ;;  %v3308_v20 = vcombine.low %v2241_v4, %v2251_v61  ;;  %v2284_v43 = vrot.slane %v2283_v9, 4  ;;  %v2320_v15 = vshll.u32 %v4839_v62, 16 }
  0xdd   : > { %3581 = vmatmul.mubr.msk.bf16.gmra.mrb[12].mxu0 %vm529_vm4, %v3858_v32  ;;  %v2217_v32 = vsel %vm4160_vm3, %v2212_v49, %v4770_v24  ;;  %v2301_v24 = vshrl.u32 %v3301_v56, 16  ;;  %v2294_v49 = vrot.slane %v2293_v27, 4  ;;  %v2531_v4 = vrot.slane %v4679_v54, 5 }
  0xde   : > { %3586 = vmatprep.mubr.msk.bf16.mxu0 %vm529_vm4, %v3304_v23  ;;  %v2227_v23 = vsel %vm4160_vm3, %v2222_v12, %v2226_v41  ;;  %v2260_v30 = vrot.slane %v2259_v46, 4  ;;  %v2289_v44 = vsel %vm4160_vm3, %v2284_v43, %v2288_v17  ;;  %v2322_v39 = vrot.slane %v2320_v15, 5 }
  0xdf   : > { %v3307_v7 = vcombine.low %v2217_v32, %v2227_v23  ;;  %v2303_v2 = vrot.slane %v2301_v24, 4  ;;  %v2527_v17 = vrot.slane %v4702_v40, 5  ;;  %v3866_v32 = vld [vmem:[%s4121_s27 + $0x60] sm:$0xff]   ;;  %v2538_v46 = vrot.slane %v4708_v14, 5 }
  0xe0   : > { %3515 = vmatmul.mubr.msk.bf16.vlgmr.msra.gmra.mrb[0].mxu1 %vm529_vm4, %v3860_v16  ;;  %v2310_v16 = vshll.u32 %v4813_v58, 16  ;;  %v2265_v50 = vsel %vm4160_vm3, %v2260_v30, %v2264_v59  ;;  %v3320_v59 = vld [vmem:[%s4121_s27 + $0x18] sm:$0xe]  ;;  %v3321_v40 = vld [vmem:[%s4121_s27 + $0x24] sm:$0xe]  ;;  %v2533_v47 = vrot.slane %v2531_v4, 4 }
  0xe1   : > { %3518 = vmatprep.mubr.msk.bf16.mxu1 %vm529_vm4, %v3861_v25  ;;  %v2270_v25 = vrot.slane %v2269_v34, 4  ;;  %v2307_v3 = vor.u32 %v2306_v6, %v2303_v2  ;;  %v3328_v31 = vrot.slane %v3320_v59, 9  ;;  %v3322_v34 = vld [vmem:[%s4121_s27 + $0x30] sm:$0xe]  ;;  %v3329_v29 = vrot.slane %v3321_v40, 9 }
  0xe2   : > { %v2312_v11 = vrot.slane %v2310_v16, 5  ;;  %v2534_v54 = vrot.slane %v4711_v60, 5  ;;  %v3330_v16 = vrot.slane %v3322_v34, 9  ;;  %v2540_v57 = vrot.slane %v2538_v46, 4  ;;  %v3324_v30 = vld [vmem:[%s4121_s27 + $0x48] sm:$0xe] }
  0xe3   : > { %v2275_v12 = vsel %vm4160_vm3, %v2270_v25, %v2274_v13  ;;  %v2308_v56 = vrot.slane %v2307_v3, 4  ;;  %v2541_v9 = vrot.slane %v4729_v28, 5  ;;  %v2532_v14 = vsel %vm4417_vm7, %v3329_v29, %v2531_v4 }
  0xe4   : > { %v2317_v55 = vor.u32 %v2316_v8, %v2312_v11  ;;  %v2535_v27 = vsel %vm4417_vm7, %v2533_v47, %v2534_v54  ;;  %v2552_v28 = vrot.slane %v4742_v22, 5  ;;  %v3332_v8 = vrot.slane %v3324_v30, 9 }
  0xe5   : > { %3587 = vmatmul.mubr.msk.bf16.vlgmr.msra.gmra.mrb[0].mxu0 %vm529_vm4, %v3305_v51  ;;  %v2296_v51 = vshll.u32 %v4825_v63, 16  ;;  %v2313_v0 = vsel %vm4160_vm3, %v2308_v56, %v2312_v11  ;;  %v2542_v60 = vsel %vm4417_vm7, %v2540_v57, %v2541_v9  ;;  %v3337_v25 = vcombine.low %v2532_v14, %v2535_v27  ;;  %v3327_v56 = vld [vmem:[%s4121_s27 + $0x6c] sm:$0xe]  ;;  %v4940_v27 = vld [vmem:[%s5013_s2] ss:$0 sm:$0xff] }
  0xe6   : > { %3603 = vmatpush3.bf16.msra.mxu0 %v2629_v42  ;;  %3590 = vmatprep.mubr.msk.bf16.mxu0 %vm529_vm4, %v3306_v10  ;;  %v3309_v42 = vcombine.low %v2265_v50, %v2275_v12  ;;  %v2318_v33 = vrot.slane %v2317_v55, 4  ;;  %v2548_v11 = vrot.slane %v4764_v52, 5  ;;  %v2555_v43 = vrot.slane %v4773_v35, 5  ;;  %v3325_v50 = vld [vmem:[%s4121_s27 + $0x54] sm:$0xe] }
  0xe7   : > { %v2298_v41 = vrot.slane %v2296_v51, 5  ;;  %v2545_v51 = vrot.slane %v4732_v18, 5  ;;  %v2554_v18 = vrot.slane %v2552_v28, 4  ;;  %v2566_v35 = vrot.slane %v4789_v5, 5 }
  0xe8   : > { %3519 = vmatmul.mubr.msk.bf16.gmra.mrb[4].mxu1 %vm529_vm4, %v3862_v37  ;;  %v2526_v37 = vrot.slane %v2524_v36, 4  ;;  %v2323_v23 = vsel %vm4160_vm3, %v2318_v33, %v2322_v39  ;;  %v3333_v55 = vrot.slane %v3325_v50, 9  ;;  %v3335_v39 = vrot.slane %v3327_v56, 9 }
  0xe9   : > { %3522 = vmatprep.mubr.msk.bf16.mxu1 %vm529_vm4, %v3863_v38  ;;  %v2299_v19 = vsel %vm4160_vm3, %v2294_v49, %v2298_v41  ;;  %v2525_v38 = vsel %vm4417_vm7, %v3328_v31, %v2524_v36  ;;  %v3311_v53 = vcombine.low %v2313_v0, %v2323_v23  ;;  %v2547_v6 = vrot.slane %v2545_v51, 4  ;;  %v3867_v0 = vld [vmem:[#allocation4] sm:$0xff]   ;;  %v3868_v23 = vld [vmem:[#allocation4 + $0x8] sm:$0xff]  }
  0xea   : > { %v3310_v10 = vcombine.low %v2289_v44, %v2299_v19  ;;  %v2528_v61 = vsel %vm4417_vm7, %v2526_v37, %v2527_v17  ;;  %v2559_v41 = vrot.slane %v4782_v48, 5  ;;  %v2556_v52 = vsel %vm4417_vm7, %v2554_v18, %v2555_v43  ;;  %3620 = vmatprep.subr.bf16.mxu1 %v3867_v0 }
  0xeb   : > { %v3336_v24 = vcombine.low %v2525_v38, %v2528_v61  ;;  %v2549_v49 = vsel %vm4417_vm7, %v2547_v6, %v2548_v11  ;;  %v2562_v44 = vrot.slane %v4809_v1, 5  ;;  %v2568_v36 = vrot.slane %v2566_v35, 4  ;;  %3621 = vmatpush3.bf16.msra.mxu1 %v3867_v0 }
  0xec   : > { %v2561_v15 = vrot.slane %v2559_v41, 4  ;;  %v2569_v48 = vrot.slane %v4825_v63, 5  ;;  %v2560_v59 = vsel %vm4417_vm7, %v3333_v55, %v2559_v41  ;;  %v2576_v37 = vrot.slane %v4839_v62, 5  ;;  %3622 = vmatprep.subr.bf16.mxu1 %v3868_v23 }
  0xed   : > { %3591 = vmatmul.mubr.msk.bf16.gmra.mrb[4].mxu0 %vm529_vm4, %v3307_v7  ;;  %v2539_v7 = vsel %vm4417_vm7, %v3330_v16, %v2538_v46 }
  0xee   : > { %3594 = vmatprep.mubr.msk.bf16.mxu0 %vm529_vm4, %v3308_v20  ;;  %v3323_v20 = vld [vmem:[%s4121_s27 + $0x3c] sm:$0xe]  ;;  %v3338_v13 = vcombine.low %v2539_v7, %v2542_v60  ;;  %v2563_v5 = vsel %vm4417_vm7, %v2561_v15, %v2562_v44  ;;  %v2570_v1 = vsel %vm4417_vm7, %v2568_v36, %v2569_v48 }
  0xef   : > { %v3331_v2 = vrot.slane %v3323_v20, 9  ;;  %v3341_v63 = vcombine.low %v2560_v59, %v2563_v5  ;;  %3623 = vmatpush3.bf16.msra.mxu1 %v3868_v23 }
  0xf0   : > { %3523 = vmatmul.mubr.msk.bf16.gmra.mrb[8].mxu1 %vm529_vm4, %v3864_v45  ;;  %v2553_v45 = vsel %vm4417_vm7, %v3332_v8, %v2552_v28 }
  0xf1   : > { %3526 = vmatprep.mubr.msk.bf16.mxu1 %vm529_vm4, %v3865_v26  ;;  %v2546_v22 = vsel %vm4417_vm7, %v3331_v2, %v2545_v51  ;;  %v3326_v26 = vld [vmem:[%s4121_s27 + $0x60] sm:$0xe]  ;;  %v3340_v3 = vcombine.low %v2553_v45, %v2556_v52 }
  0xf2   : > { %v3339_v12 = vcombine.low %v2546_v22, %v2549_v49  ;;  %v3334_v19 = vrot.slane %v3326_v26, 9 }
  0xf5   : > { %3595 = vmatmul.mubr.msk.bf16.gmra.mrb[8].mxu0 %vm529_vm4, %v3309_v42  ;;  %v2573_v42 = vrot.slane %v4813_v58, 5 }
  0xf6   : > { %3598 = vmatprep.mubr.msk.bf16.mxu0 %vm529_vm4, %v3310_v10  ;;  %v2567_v10 = vsel %vm4417_vm7, %v3334_v19, %v2566_v35 }
  0xf7   : > { %v3342_v33 = vcombine.low %v2567_v10, %v2570_v1  ;;  %v2575_v31 = vrot.slane %v2573_v42, 4  ;;  %v2574_v58 = vsel %vm4417_vm7, %v3335_v39, %v2573_v42 }
  0xf8   : > { %3527 = vmatmul.mubr.msk.bf16.gmra.mrb[12].mxu1 %vm529_vm4, %v3866_v32 }
  0xf9   : > { %v2577_v17 = vsel %vm4417_vm7, %v2575_v31, %v2576_v37 }
  0xfa   : > { %v3343_v32 = vcombine.low %v2574_v58, %v2577_v17 }
  0xfd   : > { %3599 = vmatmul.mubr.msk.bf16.gmra.mrb[12].mxu0 %vm529_vm4, %v3311_v53 }
  0xfe   : > { %3604 = vmatprep.mubr.msk.bf16.mxu0 %vm529_vm4, %v3336_v24 }
 0x105   : > { %3605 = vmatmul.mubr.msk.bf16.vlgmr.msra.gmra.mrb[0].mxu0 %vm529_vm4, %v3337_v25 }
 0x106   : > { %3608 = vmatprep.mubr.msk.bf16.mxu0 %vm529_vm4, %v3338_v13 }
 0x10d   : > { %3609 = vmatmul.mubr.msk.bf16.gmra.mrb[4].mxu0 %vm529_vm4, %v3339_v12 }
 0x10e   : > { %3612 = vmatprep.mubr.msk.bf16.mxu0 %vm529_vm4, %v3340_v3 }
 0x115   : > { %3613 = vmatmul.mubr.msk.bf16.gmra.mrb[8].mxu0 %vm529_vm4, %v3341_v63 }
 0x116   : > { %3616 = vmatprep.mubr.msk.bf16.mxu0 %vm529_vm4, %v3342_v33 }
 0x11d   : > { %3617 = vmatmul.mubr.msk.bf16.gmra.mrb[12].mxu0 %vm529_vm4, %v3343_v32 }
 0x1b3   : > { %v3516_v62 = vpop.f32.mrb[0].mxu1 }
 0x1b4   : > { %v1191_v4 = vpop.f32.mrb[1].mxu1 }
 0x1b5   : > { %v3517_v38 = vpop.f32.mrb[2].mxu1 }
 0x1b6   : > { %v1194_v61 = vpop.f32.mrb[3].mxu1 }
 0x1bb   : > { %v3520_v40 = vpop.f32.mrb[4].mxu1 }
 0x1bc   : > { %v1207_v46 = vpop.f32.mrb[5].mxu1 }
 0x1bd   : > { %v3521_v34 = vpop.f32.mrb[6].mxu1 }
 0x1be   : > { %v1210_v53 = vpop.f32.mrb[7].mxu1 }
 0x1c3   : > { %v3524_v24 = vpop.f32.mrb[8].mxu1 }
 0x1c4   : > { %v1223_v21 = vpop.f32.mrb[9].mxu1 }
 0x1c5   : > { %v3525_v29 = vpop.f32.mrb[10].mxu1 }
 0x1c6   : > { %v1226_v47 = vpop.f32.mrb[11].mxu1 }
 0x1cb   : > { %v4929_v54 = vpop.f32.mrb[12].mxu1 }
 0x1cc   : > { %v4931_v16 = vpop.f32.mrb[13].mxu1 }
 0x1cd   : > { %v4933_v57 = vpop.f32.mrb[14].mxu1 }
 0x1ce   : > { %v4935_v9 = vpop.f32.mrb[15].mxu1 }
 0x1d8   : > { %v3606_v14 = vpop.f32.mrb[0].mxu0 }
 0x1d9   : > { %v3640_v51 = vadd.f32 %v3606_v14, %v3516_v62  ;;  %v2665_v7 = vpop.f32.mrb[1].mxu0 }
 0x1da   : > { %v3641_v60 = vadd.f32 %v2665_v7, %v1191_v4  ;;  %v3607_v20 = vpop.f32.mrb[2].mxu0 }
 0x1db   : > { %v2753_v28 = vadd.f32 %v3640_v51, %v4940_v27  ;;  %v3642_v30 = vadd.f32 %v3607_v20, %v3517_v38  ;;  %v2668_v25 = vpop.f32.mrb[3].mxu0 }
 0x1dc   : > { %v2751_v13 = vadd.f32 %v3641_v60, %v4940_v27  ;;  %v3643_v2 = vadd.f32 %v2668_v25, %v1194_v61 }
 0x1dd   : > { %v2754_v6 = vadd.f32 %v3642_v30, %v4940_v27  ;;  %v2769_v8 = vmax.f32 %v2753_v28, 0.0 }
 0x1de   : > { %v2752_v11 = vadd.f32 %v3643_v2, %v4940_v27  ;;  %v2767_v43 = vmax.f32 %v2751_v13, 0.0 }
 0x1df   : > { %v2770_v18 = vmax.f32 %v2754_v6, 0.0 }
 0x1e0   : > { %v2768_v22 = vmax.f32 %v2752_v11, 0.0  ;;  %v3610_v49 = vpop.f32.mrb[4].mxu0 }
 0x1e1   : > { %v2784_v41 = vpack.c.bf16 %v2770_v18, %v2769_v8  ;;  %v3644_v45 = vadd.f32 %v3610_v49, %v3520_v40  ;;  %v2681_v52 = vpop.f32.mrb[5].mxu0 }
 0x1e2   : > { %v2783_v50 = vpack.c.bf16 %v2768_v22, %v2767_v43  ;;  %v3645_v35 = vadd.f32 %v2681_v52, %v1207_v46  ;;  %v3611_v26 = vpop.f32.mrb[6].mxu0 }
 0x1e3   : > { %v2757_v12 = vadd.f32 %v3644_v45, %v4940_v27  ;;  %v3646_v3 = vadd.f32 %v3611_v26, %v3521_v34  ;;  %v2684_v55 = vpop.f32.mrb[7].mxu0 }
 0x1e4   : > { %v2755_v15 = vadd.f32 %v3645_v35, %v4940_v27  ;;  %v3647_v44 = vadd.f32 %v2684_v55, %v1210_v53  ;;  %3624 = vmatprep.mubr.msk.bf16.mxu1 %vm2814_vm8, %v2783_v50 }
 0x1e5   : > { %v2758_v19 = vadd.f32 %v3646_v3, %v4940_v27  ;;  %3625 = vmatmul.mubr.msk.bf16.vlgmr.msra.gmra.mrb[16].mxu1 %vm2814_vm8, %v2784_v41  ;;  %v2773_v48 = vmax.f32 %v2757_v12, 0.0 }
 0x1e6   : > { %v2756_v36 = vadd.f32 %v3647_v44, %v4940_v27  ;;  %v2771_v5 = vmax.f32 %v2755_v15, 0.0 }
 0x1e7   : > { %v2774_v59 = vmax.f32 %v2758_v19, 0.0 }
 0x1e8   : > { %v2772_v42 = vmax.f32 %v2756_v36, 0.0  ;;  %v3614_v10 = vpop.f32.mrb[8].mxu0 }
 0x1e9   : > { %v2786_v1 = vpack.c.bf16 %v2774_v59, %v2773_v48  ;;  %v3648_v56 = vadd.f32 %v3614_v10, %v3524_v24  ;;  %v2697_v63 = vpop.f32.mrb[9].mxu0 }
 0x1ea   : > { %v2785_v33 = vpack.c.bf16 %v2772_v42, %v2771_v5  ;;  %v3649_v39 = vadd.f32 %v2697_v63, %v1223_v21  ;;  %v3615_v31 = vpop.f32.mrb[10].mxu0 }
 0x1eb   : > { %v2761_v37 = vadd.f32 %v3648_v56, %v4940_v27  ;;  %v3650_v58 = vadd.f32 %v3615_v31, %v3525_v29  ;;  %v2700_v17 = vpop.f32.mrb[11].mxu0 }
 0x1ec   : > { %v2759_v32 = vadd.f32 %v3649_v39, %v4940_v27  ;;  %v3651_v0 = vadd.f32 %v2700_v17, %v1226_v47  ;;  %3628 = vmatprep.mubr.msk.bf16.mxu1 %vm2814_vm8, %v2785_v33 }
 0x1ed   : > { %v2762_v23 = vadd.f32 %v3650_v58, %v4940_v27  ;;  %3629 = vmatmul.mubr.msk.bf16.gmra.mrb[20].mxu1 %vm2814_vm8, %v2786_v1  ;;  %v2777_v4 = vmax.f32 %v2761_v37, 0.0 }
 0x1ee   : > { %v2760_v62 = vadd.f32 %v3651_v0, %v4940_v27  ;;  %v2775_v61 = vmax.f32 %v2759_v32, 0.0 }
 0x1ef   : > { %v2778_v38 = vmax.f32 %v2762_v23, 0.0 }
 0x1f0   : > { %v2776_v40 = vmax.f32 %v2760_v62, 0.0  ;;  %v3618_v46 = vpop.f32.mrb[12].mxu0 }
 0x1f1   : > { %v2788_v34 = vpack.c.bf16 %v2778_v38, %v2777_v4  ;;  %v3652_v53 = vadd.f32 %v3618_v46, %v4929_v54  ;;  %v2713_v24 = vpop.f32.mrb[13].mxu0 }
 0x1f2   : > { %v2787_v21 = vpack.c.bf16 %v2776_v40, %v2775_v61  ;;  %v3653_v29 = vadd.f32 %v2713_v24, %v4931_v16  ;;  %v3619_v47 = vpop.f32.mrb[14].mxu0 }
 0x1f3   : > { %v2765_v14 = vadd.f32 %v3652_v53, %v4940_v27  ;;  %v3654_v51 = vadd.f32 %v3619_v47, %v4933_v57  ;;  %v2716_v7 = vpop.f32.mrb[15].mxu0 }
 0x1f4   : > { %v2763_v60 = vadd.f32 %v3653_v29, %v4940_v27  ;;  %v3655_v20 = vadd.f32 %v2716_v7, %v4935_v9  ;;  %3632 = vmatprep.mubr.msk.bf16.mxu1 %vm2814_vm8, %v2787_v21  ;;  %v3353_v9 = vld [vmem:[%s5015_s4] ss:$0 sm:$0xff] }
 0x1f5   : > { %v2766_v54 = vadd.f32 %v3654_v51, %v4940_v27  ;;  %3633 = vmatmul.mubr.msk.bf16.gmra.mrb[24].mxu1 %vm2814_vm8, %v2788_v34  ;;  %v2781_v28 = vmax.f32 %v2765_v14, 0.0 }
 0x1f6   : > { %v2764_v16 = vadd.f32 %v3655_v20, %v4940_v27  ;;  %v2779_v25 = vmax.f32 %v2763_v60, 0.0 }
 0x1f7   : > { %v2782_v30 = vmax.f32 %v2766_v54, 0.0 }
 0x1f8   : > { %v2780_v13 = vmax.f32 %v2764_v16, 0.0 }
 0x1f9   : > { %v2790_v57 = vpack.c.bf16 %v2782_v30, %v2781_v28 }
 0x1fa   : > { %v2789_v2 = vpack.c.bf16 %v2780_v13, %v2779_v25 }
 0x1fc   : > { %3636 = vmatprep.mubr.msk.bf16.mxu1 %vm2814_vm8, %v2789_v2 }
 0x1fd   : > { %3637 = vmatmul.mubr.msk.bf16.gmra.mrb[28].mxu1 %vm2814_vm8, %v2790_v57 }
 0x2b8   : > { %v3626_v27 = vpop.f32.mrb[16].mxu1 }
 0x2b9   : > { %v2882_v6 = vadd.f32 %v3626_v27, %v3353_v9  ;;  %v2873_v11 = vpop.f32.mrb[17].mxu1 }
 0x2ba   : > { %v2874_v8 = vadd.f32 %v3353_v9, %v2873_v11  ;;  %v3627_v18 = vpop.f32.mrb[18].mxu1 }
 0x2bb   : > { %2938 = vst [vmem:[%s4978_s15 + $0x10] sm:$0xff] %v2882_v6  ;;  %v2885_v43 = vadd.f32 %v3627_v18, %v3353_v9  ;;  %v2876_v22 = vpop.f32.mrb[19].mxu1 }
 0x2bc   : > { %2936 = vst [vmem:[%s4978_s15] sm:$0xff] %v2874_v8  ;;  %v2877_v49 = vadd.f32 %v3353_v9, %v2876_v22 }
 0x2bd   : > { %2939 = vst [vmem:[%s4978_s15 + $0x18] sm:$0xff] %v2885_v43 }
 0x2be   : > { %2937 = vst [vmem:[%s4978_s15 + $0x8] sm:$0xff] %v2877_v49 }
 0x2c0   : > { %v3630_v41 = vpop.f32.mrb[20].mxu1 }
 0x2c1   : > { %v2898_v45 = vadd.f32 %v3630_v41, %v3353_v9  ;;  %v2889_v52 = vpop.f32.mrb[21].mxu1 }
 0x2c2   : > { %v2890_v50 = vadd.f32 %v3353_v9, %v2889_v52  ;;  %v3631_v35 = vpop.f32.mrb[22].mxu1 }
 0x2c3   : > { %2942 = vst [vmem:[%s4978_s15 + $0x30] sm:$0xff] %v2898_v45  ;;  %v2901_v26 = vadd.f32 %v3631_v35, %v3353_v9  ;;  %v2892_v12 = vpop.f32.mrb[23].mxu1 }
 0x2c4   : > { %2940 = vst [vmem:[%s4978_s15 + $0x20] sm:$0xff] %v2890_v50  ;;  %v2893_v3 = vadd.f32 %v3353_v9, %v2892_v12 }
 0x2c5   : > { %2943 = vst [vmem:[%s4978_s15 + $0x38] sm:$0xff] %v2901_v26 }
 0x2c6   : > { %2941 = vst [vmem:[%s4978_s15 + $0x28] sm:$0xff] %v2893_v3 }
 0x2c8   : > { %v3634_v55 = vpop.f32.mrb[24].mxu1 }
 0x2c9   : > { %v2914_v15 = vadd.f32 %v3634_v55, %v3353_v9  ;;  %v2905_v44 = vpop.f32.mrb[25].mxu1 }
 0x2ca   : > { %v2906_v19 = vadd.f32 %v3353_v9, %v2905_v44  ;;  %v3635_v36 = vpop.f32.mrb[26].mxu1 }
 0x2cb   : > { %2946 = vst [vmem:[%s4978_s15 + $0x50] sm:$0xff] %v2914_v15  ;;  %v2917_v48 = vadd.f32 %v3635_v36, %v3353_v9  ;;  %v2908_v59 = vpop.f32.mrb[27].mxu1 }
 0x2cc   : > { %2944 = vst [vmem:[%s4978_s15 + $0x40] sm:$0xff] %v2906_v19  ;;  %v2909_v5 = vadd.f32 %v3353_v9, %v2908_v59 }
 0x2cd   : > { %2947 = vst [vmem:[%s4978_s15 + $0x58] sm:$0xff] %v2917_v48 }
 0x2ce   : > { %2945 = vst [vmem:[%s4978_s15 + $0x48] sm:$0xff] %v2909_v5 }
 0x2d0   : > { %v3638_v42 = vpop.f32.mrb[28].mxu1 }
 0x2d1   : > { %v2930_v10 = vadd.f32 %v3638_v42, %v3353_v9  ;;  %v2921_v1 = vpop.f32.mrb[29].mxu1 }
 0x2d2   : > { %v2922_v56 = vadd.f32 %v3353_v9, %v2921_v1  ;;  %v3639_v63 = vpop.f32.mrb[30].mxu1 }
 0x2d3   : > { %2950 = vst [vmem:[%s4978_s15 + $0x70] sm:$0xff] %v2930_v10  ;;  %v2933_v33 = vadd.f32 %v3639_v63, %v3353_v9  ;;  %v2924_v39 = vpop.f32.mrb[31].mxu1 }
 0x2d4   : > { %2948 = vst [vmem:[%s4978_s15 + $0x60] sm:$0xff] %v2922_v56  ;;  %v2925_v31 = vadd.f32 %v3353_v9, %v2924_v39 }
 0x2d5   : > { %2951 = vst [vmem:[%s4978_s15 + $0x78] sm:$0xff] %v2933_v33 }
 0x2d6   : > { %2949 = vst [vmem:[%s4978_s15 + $0x68] sm:$0xff] %v2925_v31 }
 0x2d7 PF: > { %s17_s22 = sadd.s32 1, %s3971_s22   ;;  %s5045_s18 = smov %s3963_s20 }
 0x2d8   : > { %p14_p8 = scmp.ge.s32.totalorder %s17_s22, 6   ;;  %s5046_s19 = smov %s3967_s21 }
 0x2d9   : > { %s5047_s20 = smov %s5050_s24  ;;  %s5048_s21 = smov %s5054_s25 }
 0x2da   :  { %16 = sbr.rel (!%p14_p8) target bundleno = 4 (0x4), region = 90 }
 0x2e1   :  { %2982 = vsyncpa [#allocation3], 1 }
 0x2e2   :  { %2984 = vsyncpa [#allocation3 + $0x1], 1 }
 0x2e3   :  { %2985 = vsyncpa [#allocation5], 1 }

</bundles_post_ra>
